<compile_context>
chip_gen: v7x
topology: tpu7x:2x2x1
jax: 0.10.0
libtpu: 0.0.40
codegen_flags: <defaults>
</compile_context>

<pallas_src>
import functools

import numpy as np
import jax
import jax.numpy as jnp
from jax import lax
from jax.experimental import pallas as pl
from jax.experimental.pallas import tpu as pltpu

# --------------------------------------------------------------------------------------
# Deterministic parameter construction (mirrors make_directions / make_kernel / make_moves)
# --------------------------------------------------------------------------------------
SQ2 = 2.0 ** (-0.5)


def make_directions_np():
    return np.array(
        [[SQ2, SQ2], [0.0, 1.0], [-SQ2, SQ2], [1.0, 0.0], [0.0, 0.0],
         [-1.0, 0.0], [SQ2, -SQ2], [0.0, -1.0], [-SQ2, -SQ2]],
        dtype=np.float64,
    )


def make_kernel_np(x_mul=1.0, y_mul=1.0, pow_=1.0, swap=False):
    grid = np.array([-1.0, 0.0, 1.0], dtype=np.float64)
    gx, gy = np.meshgrid(grid, grid, indexing="ij")       # torch.meshgrid default 'ij'
    d = np.sqrt(gx ** 2 + gy ** 2)
    inv = np.where(np.isclose(d, 0.0), 0.0, 1.0 / np.where(d == 0.0, 1.0, d))
    gx = gx * inv
    gy = gy * inv
    gx = x_mul * gx / (np.abs(gx).sum() ** pow_)
    gy = y_mul * gy / (np.abs(gy).sum() ** pow_)
    k = np.stack([gx, gy], 0) if swap else np.stack([gy, gx], 0)
    return k.reshape(2, 1, 3, 3)


def make_moves_np():
    moves = np.zeros((1, 9, 3, 3), dtype=np.float32)
    positions = [(2, 2), (2, 1), (2, 0), (1, 2), (1, 1), (1, 0), (0, 2), (0, 1), (0, 0)]
    for k, (r, c) in enumerate(positions):
        moves[0, k, r, c] = 1.0
    return moves


DIRECTIONS = make_directions_np()                 # (9, 2)
KERNEL = make_kernel_np()                         # (2, 1, 3, 3)
KERNEL_FLAT = KERNEL.reshape(2, 9)                # F.unfold(kernel, 3) ordering (kh*3+kw)
MOVES = make_moves_np()                           # (1, 9, 3, 3)
# `moves` conv == circular shift (row-1, col-1) per direction channel:
MOVE_SHIFTS = [(1, 1), (1, 0), (1, -1), (0, 1), (0, 0), (0, -1), (-1, 1), (-1, 0), (-1, -1)]

V_MAX = 5.0
ATTRACTION = 1.0
REPULSION = 5.0
FRICTION = 0.1
RANDOM = 1.0

# --- separable structure of the facing/attraction stencil used by the kernel -----------
# coef[n, k] = -KERNEL_FLAT[n, k].  The x-component uses only the kw=0 / kw=2 columns and
# the y-component only the kh=0 / kh=2 rows, each with weights (WC, WM, WC).
_COEF = -KERNEL_FLAT
WC = float(_COEF[0, 0])
WM = float(_COEF[0, 3])
assert np.allclose(_COEF[0], [WC, 0.0, -WC, WM, 0.0, -WM, WC, 0.0, -WC])
assert np.allclose(_COEF[1], [WC, WM, WC, 0.0, 0.0, 0.0, -WC, -WM, -WC])
assert np.all((DIRECTIONS[:, 0] > 0) == np.array([1, 0, 0, 1, 0, 0, 1, 0, 0], bool))
assert np.all((DIRECTIONS[:, 0] < 0) == np.array([0, 0, 1, 0, 0, 1, 0, 0, 1], bool))
assert np.all((DIRECTIONS[:, 1] > 0) == np.array([1, 1, 1, 0, 0, 0, 0, 0, 0], bool))
assert np.all((DIRECTIONS[:, 1] < 0) == np.array([0, 0, 0, 0, 0, 0, 1, 1, 1], bool))

# --------------------------------------------------------------------------------------
# Tiling configuration
# --------------------------------------------------------------------------------------
_HALO = 8          # wrap-halo rows per side.  Stencil depth is only 3 (pool 1 + sense 1 +
                   # scatter 1), but 8 keeps every interior slice 8-sublane aligned.
_VMEM_PLANES = 64  # rough live (tile_h+2*halo, W) f32 plane count for VMEM budgeting
                   # (dbl-buffered I/O + cached exps + temps).


def _pick_tile_h(h, w, budget_bytes=40 * 1024 * 1024):
    """Largest multiple-of-8 divisor of H (<=256) whose tile footprint fits the budget."""
    divisors = [t for t in range(8, h + 1, 8) if h % t == 0]
    if not divisors:
        return h                              # small / odd H: single tile, full extent
    fitting = [t for t in divisors
               if t <= 256 and 4 * (t + 2 * _HALO) * w * _VMEM_PLANES <= budget_bytes]
    return max(fitting) if fitting else min(divisors)


# --------------------------------------------------------------------------------------
# Circular shifts: pltpu.roll (XLU vrot) with a one-off sign probe + jnp.roll fallback
# --------------------------------------------------------------------------------------
_ROLL_MODE = None  # +1: pltpu.roll == jnp.roll, -1: opposite sign, 0: use jnp.roll


def _probe_roll():
    x = jnp.arange(16 * 128, dtype=jnp.float32).reshape(16, 128)
    try:
        def _k(x_ref, a_ref, b_ref):
            a_ref[...] = pltpu.roll(x_ref[...], 1, axis=0)
            b_ref[...] = pltpu.roll(x_ref[...], 1, axis=1)

        a, b = pl.pallas_call(
            _k,
            out_shape=(jax.ShapeDtypeStruct((16, 128), jnp.float32),
                       jax.ShapeDtypeStruct((16, 128), jnp.float32)),
        )(x)
        a, b = np.asarray(a), np.asarray(b)
    except Exception:
        return 0
    if (np.array_equal(a, np.asarray(jnp.roll(x, 1, 0))) and
            np.array_equal(b, np.asarray(jnp.roll(x, 1, 1)))):
        return 1
    if (np.array_equal(a, np.asarray(jnp.roll(x, -1, 0))) and
            np.array_equal(b, np.asarray(jnp.roll(x, -1, 1)))):
        return -1
    return 0


def _roll_mode():
    global _ROLL_MODE
    if _ROLL_MODE is None:
        _ROLL_MODE = _probe_roll()
    return _ROLL_MODE


def _roll1(x, shift, axis, mode):
    if mode == 0:
        return jnp.roll(x, shift, axis)
    s = (shift * mode) % x.shape[axis]        # non-negative static shift
    return pltpu.roll(x, s, axis) if s else x


def _cshift(x, dh, dw, mode=0):
    """Circular neighbour fetch: out[h, w] = x[(h+dh) % H, (w+dw) % W]."""
    if dh:
        x = _roll1(x, -dh, 0, mode)
    if dw:
        x = _roll1(x, -dw, 1, mode)
    return x


# --------------------------------------------------------------------------------------
# Pallas kernel (one H-tile + wrap halo per grid step)
# --------------------------------------------------------------------------------------
def _rule_kernel(fields_ref, mass_o, trail_o, mom_o, force_o, sums_o, *,
                 A, dt, temp, halo, tile_h, roll_mode):
    cs = functools.partial(_cshift, mode=roll_mode)

    # fields_ref: (6, 1, tile_h + 2*halo, W) = [mass, trail, mom0, mom1, noise0, noise1]
    mass = fields_ref[0, 0]                    # (R, W), R = tile_h + 2*halo
    trail = fields_ref[1, 0]
    mom0 = fields_ref[2, 0]
    mom1 = fields_ref[3, 0]
    noise0 = fields_ref[4, 0]
    noise1 = fields_ref[5, 0]
    zero = jnp.zeros_like(mass)
    lo, hi = halo, halo + tile_h               # interior rows written to the outputs

    # --- trail deposit + separable 3x3 circular average pool + decay --------------------
    t = trail + mass
    rows = t + cs(t, -1, 0) + cs(t, 1, 0)
    pooled = rows + cs(rows, 0, -1) + cs(rows, 0, 1)
    trail_new = ((1.0 - A) / 9.0) * pooled
    trail_o[0] = trail_new[lo:hi]

    # --- guarded 1/mass: EUP approx reciprocal + one Newton step -------------------------
    small = mass < 1e-8
    safe = jnp.where(small, 1.0, mass)
    r = pl.reciprocal(safe, approx=True)
    r = r * (2.0 - safe * r)                   # ~f32 accuracy
    inv_mass = jnp.where(small, 0.0, r)
    velx = mom0 * inv_mass
    vely = mom1 * inv_mass

    # --- sensing: fused field S + two separable 3-tap filters ---------------------------
    #   force_x(h,w) = 1[velx>0]*Tcol[h, w-1] - 1[velx<0]*Tcol[h, w+1] - 9*FR*velx + noise_x
    #   force_y(h,w) = 1[vely>0]*Urow[h-1, w] - 1[vely<0]*Urow[h+1, w] - 9*FR*vely + noise_y
    S = ATTRACTION * trail_new - REPULSION * mass
    t_col = WC * cs(S, -1, 0) + WM * S + WC * cs(S, 1, 0)
    u_row = WC * cs(S, 0, -1) + WM * S + WC * cs(S, 0, 1)
    att_x_pos = cs(t_col, 0, -1)
    att_x_neg = cs(t_col, 0, 1)
    att_y_pos = cs(u_row, -1, 0)
    att_y_neg = cs(u_row, 1, 0)

    fric = 9.0 * FRICTION
    force0 = (jnp.where(velx > 0.0, att_x_pos, zero)
              - jnp.where(velx < 0.0, att_x_neg, zero)
              - fric * velx + RANDOM * noise0)
    force1 = (jnp.where(vely > 0.0, att_y_pos, zero)
              - jnp.where(vely < 0.0, att_y_neg, zero)
              - fric * vely + RANDOM * noise1)
    force_o[0] = force0[lo:hi]
    force_o[1] = force1[lo:hi]

    # --- momentum update + speed cap (compare squared norms, no sqrt) -------------------
    m0 = jnp.where(small, zero, mom0 + force0 * dt)
    m1 = jnp.where(small, zero, mom1 + force1 * dt)
    nsq = m0 * m0 + m1 * m1
    cap = V_MAX * mass
    inv_norm = lax.rsqrt(jnp.where(nsq > 0.0, nsq, 1.0))
    scale = jnp.where(nsq > cap * cap, V_MAX * inv_norm, 1.0)
    m0 = m0 * scale
    m1 = m1 * scale
    vx = m0 * inv_mass
    vy = m1 * inv_mass

    # --- propagation softmax over the 9 directions (logits / exps computed ONCE) --------
    svx = SQ2 * vx
    svy = SQ2 * vy
    raw = (svx + svy, vy, svy - svx, vx, None, -vx, svx - svy, -vy, -svx - svy)
    floor = 1e-10 * temp
    logits = []
    for k in range(9):
        if k == 4:
            logits.append(None)                # center direction: constant logit
            continue
        p = raw[k]
        logits.append(jnp.where(p > 0.0, p * temp, floor))

    # Running max kept on purpose (see header note): |v| can be V_MAX/mass for capped
    # low-mass cells, so the logits are NOT bounded by V_MAX*temp and exp() could overflow.
    pmax = logits[0]
    for k in (1, 2, 3, 5, 6, 7, 8):
        pmax = jnp.maximum(pmax, logits[k])
    exps = []
    for k in range(9):
        l = floor if k == 4 else logits[k]
        exps.append(jnp.exp(l - pmax))
    denom = exps[0]
    for k in range(1, 9):
        denom = denom + exps[k]
    inv_denom = pl.reciprocal(denom, approx=True)

    # --- scatter mass / momentum with the `moves` circular conv, grouped by row shift ---
    # inv_denom is pre-multiplied into the three fields once (3 muls) instead of into each
    # of the 9 probabilities (27 muls).
    mass_n = mass * inv_denom
    m0_n = m0 * inv_denom
    m1_n = m1 * inv_denom
    new_mass = zero
    new_m0 = zero
    new_m1 = zero
    for g, dh in enumerate((1, 0, -1)):
        gm = zero
        g0 = zero
        g1 = zero
        for j, dw in enumerate((1, 0, -1)):
            k = 3 * g + j                      # (dh, dw) == MOVE_SHIFTS[k]
            e = exps[k]
            gm = gm + cs(mass_n * e, 0, dw)
            g0 = g0 + cs(m0_n * e, 0, dw)
            g1 = g1 + cs(m1_n * e, 0, dw)
        new_mass = new_mass + cs(gm, dh, 0)
        new_m0 = new_m0 + cs(g0, dh, 0)
        new_m1 = new_m1 + cs(g1, dh, 0)

    mass_o[0] = new_mass[lo:hi]
    mom_o[0] = new_m0[lo:hi]
    mom_o[1] = new_m1[lo:hi]

    # --- per-tile partial sums so the wrapper's renormalization needs no plane re-reads --
    m_sum = jnp.sum(mass[lo:hi])               # input-mass total (interior rows only)
    r_sum = jnp.sum(new_mass[lo:hi])           # unnormalized new-mass total
    row = lax.broadcasted_iota(jnp.int32, (8, 128), 0)
    sums_o[0] = jnp.where(row < 4, m_sum, r_sum)


# --------------------------------------------------------------------------------------
# Wrapper: layout glue, halo gather, pallas_call, global renormalization
# --------------------------------------------------------------------------------------
@functools.partial(jax.jit, static_argnames=("A", "dt", "temp", "tile_h", "roll_mode"))
def _rule_forward_impl(mass, trail, momentum, noise, *, A, dt, temp, tile_h, roll_mode):
    H, W = mass.shape[-2], mass.shape[-1]
    mass3 = mass.reshape(1, H, W).astype(jnp.float32)
    trail3 = trail.reshape(1, H, W).astype(jnp.float32)
    mom3 = momentum.reshape(2, H, W).astype(jnp.float32)
    # The kernel only ever uses the sum of the 9 per-direction noise planes.
    noise3 = noise.astype(jnp.float32).reshape(2, 9, H, W).sum(axis=1)
    fields = jnp.concatenate([mass3, trail3, mom3, noise3], axis=0)   # (6, H, W)

    n_tiles = H // tile_h
    ext_h = tile_h + 2 * _HALO
    # Per-tile circular row gather: tile i covers rows [i*T - HALO, i*T + T + HALO) mod H.
    idx = np.mod(np.arange(n_tiles, dtype=np.int64)[:, None] * tile_h
                 + np.arange(-_HALO, tile_h + _HALO, dtype=np.int64)[None, :],
                 H).astype(np.int32)
    fields_t = jnp.take(fields, jnp.asarray(idx), axis=1)             # (6, n_tiles, ext_h, W)

    kernel = functools.partial(_rule_kernel, A=float(A), dt=float(dt), temp=float(temp),
                               halo=_HALO, tile_h=tile_h, roll_mode=roll_mode)

    out_shape = (
        jax.ShapeDtypeStruct((1, H, W), jnp.float32),       # unnormalized new mass
        jax.ShapeDtypeStruct((1, H, W), jnp.float32),       # trail
        jax.ShapeDtypeStruct((2, H, W), jnp.float32),       # momentum
        jax.ShapeDtypeStruct((2, H, W), jnp.float32),       # force
        jax.ShapeDtypeStruct((n_tiles, 8, 128), jnp.float32),  # per-tile partial sums
    )
    in_specs = [pl.BlockSpec((6, 1, ext_h, W), lambda i: (0, i, 0, 0))]
    out_specs = (
        pl.BlockSpec((1, tile_h, W), lambda i: (0, i, 0)),
        pl.BlockSpec((1, tile_h, W), lambda i: (0, i, 0)),
        pl.BlockSpec((2, tile_h, W), lambda i: (0, i, 0)),
        pl.BlockSpec((2, tile_h, W), lambda i: (0, i, 0)),
        pl.BlockSpec((1, 8, 128), lambda i: (i, 0, 0)),
    )

    # VMEM budget from the actual tile footprint, capped below v7x's 64 MiB physical VMEM.
    est = 4 * ext_h * W * _VMEM_PLANES
    vmem_limit = int(min(48 * 1024 * 1024, max(32 * 1024 * 1024, int(est * 1.25))))

    raw_mass, new_trail, new_mom, new_force, sums = pl.pallas_call(
        kernel,
        out_shape=out_shape,
        grid=(n_tiles,),
        in_specs=in_specs,
        out_specs=out_specs,
        compiler_params=pltpu.CompilerParams(
            dimension_semantics=("parallel",),
            vmem_limit_bytes=vmem_limit,
        ),
    )(fields_t)

    # Global renormalization: only two tiny reductions over the per-tile partial sums plus
    # a single scalar*plane multiply (no full-plane re-reads for the totals).
    mass_tot = jnp.sum(sums[:, 0, 0])
    raw_sum = jnp.sum(sums[:, 4, 0])
    new_mass = (mass_tot / (raw_sum + 1e-10)) * raw_mass

    return (new_mass.reshape(1, 1, H, W),
            new_trail.reshape(1, 1, H, W),
            new_mom.reshape(2, 1, H, W),
            new_force.reshape(2, 1, H, W))


def rule_forward(mass, trail, momentum, force, noise, A=1.0, dt=0.01, temp=1.0, tile_h=None):
    # mass, trail: (1,1,H,W); momentum, force: (2,1,H,W); noise: (2,9,H,W).
    # `force` input is unused by the torch module (it is overwritten) — kept for fidelity.
    del force
    H, W = mass.shape[-2], mass.shape[-1]
    if tile_h is None:
        tile_h = _pick_tile_h(H, W)
    if H % tile_h != 0:
        raise ValueError(f"tile_h={tile_h} must divide H={H}")
    return _rule_forward_impl(mass, trail, momentum, noise,
                              A=float(A), dt=float(dt), temp=float(temp),
                              tile_h=int(tile_h), roll_mode=_roll_mode())


# --------------------------------------------------------------------------------------
# Pure-JAX reference (mirrors the torch forward with pad/conv/unfold ops) for validation
# --------------------------------------------------------------------------------------
def _circ_pad(x, p=1):
    return jnp.pad(x, ((0, 0), (0, 0), (p, p), (p, p)), mode="wrap")


def _unfold3(x):
    # x: (N, C, H+2, W+2) -> (N, C*9, H*W) like F.unfold(x, 3)
    N, C, Hp, Wp = x.shape
    H, W = Hp - 2, Wp - 2
    patches = []
    for c in range(C):
        for kh in range(3):
            for kw in range(3):
                patches.append(x[:, c, kh:kh + H, kw:kw + W].reshape(N, H * W))
    return jnp.stack(patches, axis=1)


def _conv3(x, w):
    return jax.lax.conv_general_dilated(
        x, w, (1, 1), "VALID",
        dimension_numbers=("NCHW", "OIHW", "NCHW"),
        precision=jax.lax.Precision.HIGHEST)


def rule_forward_ref(mass, trail, momentum, force, noise, A=1.0, dt=0.01, temp=1.0):
    del force
    H, W = trail.shape[-2], trail.shape[-1]
    directions = jnp.asarray(DIRECTIONS, jnp.float32)
    kernel = jnp.asarray(KERNEL, jnp.float32)
    moves = jnp.asarray(MOVES, jnp.float32)

    trail = trail + mass
    trail = _conv3(_circ_pad(trail), jnp.ones((1, 1, 3, 3), jnp.float32) / 9.0)
    trail = (1.0 - A) * trail

    velocity = jnp.where(mass < 1e-8, 0.0, momentum / mass)
    velocity_u = velocity.reshape(2, 1, H * W)
    kernel_u = (-kernel).reshape(2, 9, 1)
    facing = kernel_u * (velocity_u * directions.T[:, :, None] > 0.0)

    trail_u = _unfold3(_circ_pad(trail))
    mass_u = _unfold3(_circ_pad(mass))
    new_force = ATTRACTION * (trail_u * facing)
    new_force = new_force - REPULSION * (mass_u * facing)
    new_force = new_force - FRICTION * velocity_u
    new_force = new_force + RANDOM * noise.reshape(2, 9, H * W)
    new_force = new_force.reshape(2, 9, H, W).sum(axis=1, keepdims=True)
    force = new_force

    momentum = jnp.where(mass < 1e-8, 0.0, momentum + force * dt)
    norm = jnp.linalg.norm(momentum, axis=0, keepdims=True)
    momentum = jnp.where(norm > V_MAX * mass, V_MAX * momentum / norm, momentum)
    velocity = jnp.where(mass < 1e-8, 0.0, momentum / mass)

    propagation = jnp.einsum("dn,nchw->cdhw", directions, velocity)
    propagation = jnp.where(propagation <= 0.0, 1e-10, propagation)
    propagation = jax.nn.softmax(propagation * temp, axis=1)
    propagation = jnp.where(propagation <= 0.0, 0.0, propagation)

    mass_tot = mass.sum()
    mass_prop = mass * propagation
    mom_prop = momentum * propagation
    mass_new = _conv3(_circ_pad(mass_prop), moves)
    momentum_new = _conv3(_circ_pad(mom_prop), moves)
    mass_new = mass_tot * mass_new / (mass_new.sum() + 1e-10)
    return mass_new, trail, momentum_new, force


# --------------------------------------------------------------------------------------
if __name__ == "__main__":
    key = jax.random.PRNGKey(0)
    k1, k2, k3, k4 = jax.random.split(key, 4)
    H, W = 16, 128     # lane-dense: W sits on the lane axis; tile_h=8 -> 2-tile grid

    mass = jax.random.uniform(k1, (1, 1, H, W), jnp.float32, 0.5, 1.5)
    trail = jax.random.uniform(k2, (1, 1, H, W), jnp.float32, 0.0, 1.0)
    momentum = 0.1 * jax.random.normal(k3, (2, 1, H, W), jnp.float32)
    force = jnp.zeros((2, 1, H, W), jnp.float32)
    # torch.randn_like(new_force) equivalent, generated outside the kernel:
    noise = jax.random.normal(k4, (2, 9, H, W), jnp.float32)

    outs = rule_forward(mass, trail, momentum, force, noise,
                        A=0.9, dt=0.01, temp=1.0, tile_h=8)
    outs = jax.block_until_ready(outs)

    refs = rule_forward_ref(mass, trail, momentum, force, noise, A=0.9, dt=0.01, temp=1.0)
    refs = jax.block_until_ready(refs)

    for name, o, r in zip(["mass", "trail", "momentum", "force"], outs, refs):
        assert o.shape == r.shape, (name, o.shape, r.shape)
        np.testing.assert_allclose(np.asarray(o), np.asarray(r),
                                   rtol=2e-3, atol=1e-3, err_msg=name)

    print("KERNEL_OK")
</pallas_src>

<mosaic_0001>
module attributes {stable_mosaic.version = 11 : i64} {
  func.func @_k(%arg0: memref<16x128xf32, #tpu.memory_space<vmem>>, %arg1: memref<16x128xf32, #tpu.memory_space<vmem>>, %arg2: memref<16x128xf32, #tpu.memory_space<vmem>>) attributes {dimension_semantics = [], scalar_prefetch = 0 : i64, scratch_operands = 0 : i64, tpu.core_type = #tpu.core_type<tc>} {
    %c0 = arith.constant 0 : index
    %c0_0 = arith.constant 0 : index
    %0 = vector.load %arg0[%c0, %c0_0] : memref<16x128xf32, #tpu.memory_space<vmem>>, vector<16x128xf32>
    %c1_i32 = arith.constant 1 : i32
    %1 = tpu.dynamic_rotate %0 by %c1_i32 dim 0 : vector<16x128xf32>, i32 -> vector<16x128xf32>
    %c0_1 = arith.constant 0 : index
    %c0_2 = arith.constant 0 : index
    %2 = vector.load %arg1[%c0_1, %c0_2] : memref<16x128xf32, #tpu.memory_space<vmem>>, vector<16x128xf32>
    tpu.vector_store %arg1[%c0_1, %c0_2], %1 {strides = array<i32>} : memref<16x128xf32, #tpu.memory_space<vmem>>, vector<16x128xf32>,
    %c0_3 = arith.constant 0 : index
    %c0_4 = arith.constant 0 : index
    %3 = vector.load %arg0[%c0_3, %c0_4] : memref<16x128xf32, #tpu.memory_space<vmem>>, vector<16x128xf32>
    %c1_i32_5 = arith.constant 1 : i32
    %4 = tpu.dynamic_rotate %3 by %c1_i32_5 dim 1 : vector<16x128xf32>, i32 -> vector<16x128xf32>
    %c0_6 = arith.constant 0 : index
    %c0_7 = arith.constant 0 : index
    %5 = vector.load %arg2[%c0_6, %c0_7] : memref<16x128xf32, #tpu.memory_space<vmem>>, vector<16x128xf32>
    tpu.vector_store %arg2[%c0_6, %c0_7], %4 {strides = array<i32>} : memref<16x128xf32, #tpu.memory_space<vmem>>, vector<16x128xf32>,
    return
  }
}

module attributes {stable_mosaic.version = 11 : i64} {
  func.func @_rule_kernel(%arg0: i32, %arg1: memref<6x1x24x128xf32, #tpu.memory_space<vmem>>, %arg2: memref<1x8x128xf32, #tpu.memory_space<vmem>>, %arg3: memref<1x8x128xf32, #tpu.memory_space<vmem>>, %arg4: memref<2x8x128xf32, #tpu.memory_space<vmem>>, %arg5: memref<2x8x128xf32, #tpu.memory_space<vmem>>, %arg6: memref<1x8x128xf32, #tpu.memory_space<vmem>>) attributes {dimension_semantics = [#tpu.dimension_semantics<parallel>], iteration_bounds = array<i64: 2>, scalar_prefetch = 0 : i64, scratch_operands = 0 : i64, tpu.core_type = #tpu.core_type<tc>, window_params = [{transform_indices = @transform_0, window_bounds = array<i64: 6, 1, 24, 128>}, {transform_indices = @transform_1, window_bounds = array<i64: 1, 8, 128>}, {transform_indices = @transform_2, window_bounds = array<i64: 1, 8, 128>}, {transform_indices = @transform_3, window_bounds = array<i64: 2, 8, 128>}, {transform_indices = @transform_4, window_bounds = array<i64: 2, 8, 128>}, {transform_indices = @transform_5, window_bounds = array<i64: 1, 8, 128>}]} {
    %c0 = arith.constant 0 : index
    %c0_0 = arith.constant 0 : index
    %c0_1 = arith.constant 0 : index
    %c0_2 = arith.constant 0 : index
    %0 = vector.load %arg1[%c0, %c0_0, %c0_1, %c0_2] : memref<6x1x24x128xf32, #tpu.memory_space<vmem>>, vector<1x1x24x128xf32>
    %1 = vector.shape_cast %0 : vector<1x1x24x128xf32> to vector<24x128xf32>
    %c1 = arith.constant 1 : index
    %c0_3 = arith.constant 0 : index
    %c0_4 = arith.constant 0 : index
    %c0_5 = arith.constant 0 : index
    %2 = vector.load %arg1[%c1, %c0_3, %c0_4, %c0_5] : memref<6x1x24x128xf32, #tpu.memory_space<vmem>>, vector<1x1x24x128xf32>
    %3 = vector.shape_cast %2 : vector<1x1x24x128xf32> to vector<24x128xf32>
    %c2 = arith.constant 2 : index
    %c0_6 = arith.constant 0 : index
    %c0_7 = arith.constant 0 : index
    %c0_8 = arith.constant 0 : index
    %4 = vector.load %arg1[%c2, %c0_6, %c0_7, %c0_8] : memref<6x1x24x128xf32, #tpu.memory_space<vmem>>, vector<1x1x24x128xf32>
    %5 = vector.shape_cast %4 : vector<1x1x24x128xf32> to vector<24x128xf32>
    %c3 = arith.constant 3 : index
    %c0_9 = arith.constant 0 : index
    %c0_10 = arith.constant 0 : index
    %c0_11 = arith.constant 0 : index
    %6 = vector.load %arg1[%c3, %c0_9, %c0_10, %c0_11] : memref<6x1x24x128xf32, #tpu.memory_space<vmem>>, vector<1x1x24x128xf32>
    %7 = vector.shape_cast %6 : vector<1x1x24x128xf32> to vector<24x128xf32>
    %c4 = arith.constant 4 : index
    %c0_12 = arith.constant 0 : index
    %c0_13 = arith.constant 0 : index
    %c0_14 = arith.constant 0 : index
    %8 = vector.load %arg1[%c4, %c0_12, %c0_13, %c0_14] : memref<6x1x24x128xf32, #tpu.memory_space<vmem>>, vector<1x1x24x128xf32>
    %9 = vector.shape_cast %8 : vector<1x1x24x128xf32> to vector<24x128xf32>
    %c5 = arith.constant 5 : index
    %c0_15 = arith.constant 0 : index
    %c0_16 = arith.constant 0 : index
    %c0_17 = arith.constant 0 : index
    %10 = vector.load %arg1[%c5, %c0_15, %c0_16, %c0_17] : memref<6x1x24x128xf32, #tpu.memory_space<vmem>>, vector<1x1x24x128xf32>
    %11 = vector.shape_cast %10 : vector<1x1x24x128xf32> to vector<24x128xf32>
    %cst = arith.constant 0.000000e+00 : f32
    %12 = vector.broadcast %cst : f32 to vector<24x128xf32>
    %13 = arith.addf %3, %1 : vector<24x128xf32>
    %14 = vector.extract_strided_slice %13 {offsets = [23, 0], sizes = [1, 128], strides = [1, 1]} : vector<24x128xf32> to vector<1x128xf32>
    %15 = vector.extract_strided_slice %13 {offsets = [0, 0], sizes = [23, 128], strides = [1, 1]} : vector<24x128xf32> to vector<23x128xf32>
    %16 = tpu.concatenate %14, %15 in 0 : vector<1x128xf32>, vector<23x128xf32> -> vector<24x128xf32>
    %17 = arith.addf %13, %16 : vector<24x128xf32>
    %18 = vector.extract_strided_slice %13 {offsets = [1, 0], sizes = [23, 128], strides = [1, 1]} : vector<24x128xf32> to vector<23x128xf32>
    %19 = vector.extract_strided_slice %13 {offsets = [0, 0], sizes = [1, 128], strides = [1, 1]} : vector<24x128xf32> to vector<1x128xf32>
    %20 = tpu.concatenate %18, %19 in 0 : vector<23x128xf32>, vector<1x128xf32> -> vector<24x128xf32>
    %21 = arith.addf %17, %20 : vector<24x128xf32>
    %22 = vector.extract_strided_slice %21 {offsets = [0, 127], sizes = [24, 1], strides = [1, 1]} : vector<24x128xf32> to vector<24x1xf32>
    %23 = vector.extract_strided_slice %21 {offsets = [0, 0], sizes = [24, 127], strides = [1, 1]} : vector<24x128xf32> to vector<24x127xf32>
    %24 = tpu.concatenate %22, %23 in 1 : vector<24x1xf32>, vector<24x127xf32> -> vector<24x128xf32>
    %25 = arith.addf %21, %24 : vector<24x128xf32>
    %26 = vector.extract_strided_slice %21 {offsets = [0, 1], sizes = [24, 127], strides = [1, 1]} : vector<24x128xf32> to vector<24x127xf32>
    %27 = vector.extract_strided_slice %21 {offsets = [0, 0], sizes = [24, 1], strides = [1, 1]} : vector<24x128xf32> to vector<24x1xf32>
    %28 = tpu.concatenate %26, %27 in 1 : vector<24x127xf32>, vector<24x1xf32> -> vector<24x128xf32>
    %29 = arith.addf %25, %28 : vector<24x128xf32>
    %cst_18 = arith.constant 0.0111111114 : f32
    %30 = vector.broadcast %cst_18 : f32 to vector<24x128xf32>
    %31 = arith.mulf %30, %29 : vector<24x128xf32>
    %32 = vector.extract_strided_slice %31 {offsets = [8, 0], sizes = [8, 128], strides = [1, 1]} : vector<24x128xf32> to vector<8x128xf32>
    %c0_19 = arith.constant 0 : index
    %c0_20 = arith.constant 0 : index
    %c0_21 = arith.constant 0 : index
    %33 = vector.load %arg3[%c0_19, %c0_20, %c0_21] : memref<1x8x128xf32, #tpu.memory_space<vmem>>, vector<1x8x128xf32>
    %34 = vector.shape_cast %33 : vector<1x8x128xf32> to vector<8x128xf32>
    %35 = vector.shape_cast %32 : vector<8x128xf32> to vector<1x8x128xf32>
    tpu.vector_store %arg3[%c0_19, %c0_20, %c0_21], %35 {strides = array<i32>} : memref<1x8x128xf32, #tpu.memory_space<vmem>>, vector<1x8x128xf32>,
    %cst_22 = arith.constant 9.99999993E-9 : f32
    %36 = vector.broadcast %cst_22 : f32 to vector<24x128xf32>
    %37 = arith.cmpf olt, %1, %36 : vector<24x128xf32>
    %cst_23 = arith.constant 1.000000e+00 : f32
    %38 = vector.broadcast %cst_23 : f32 to vector<24x128xf32>
    %39 = arith.select %37, %38, %1 : vector<24x128xi1>, vector<24x128xf32>
    %40 = tpu.reciprocal %39 {approx = true} : vector<24x128xf32> -> vector<24x128xf32>
    %41 = arith.mulf %39, %40 : vector<24x128xf32>
    %cst_24 = arith.constant 2.000000e+00 : f32
    %42 = vector.broadcast %cst_24 : f32 to vector<24x128xf32>
    %43 = arith.subf %42, %41 : vector<24x128xf32>
    %44 = arith.mulf %40, %43 : vector<24x128xf32>
    %cst_25 = arith.constant 0.000000e+00 : f32
    %45 = vector.broadcast %cst_25 : f32 to vector<24x128xf32>
    %46 = arith.select %37, %45, %44 : vector<24x128xi1>, vector<24x128xf32>
    %47 = arith.mulf %5, %46 : vector<24x128xf32>
    %48 = arith.mulf %7, %46 : vector<24x128xf32>
    %cst_26 = arith.constant 1.000000e+00 : f32
    %49 = vector.broadcast %cst_26 : f32 to vector<24x128xf32>
    %50 = arith.mulf %49, %31 : vector<24x128xf32>
    %cst_27 = arith.constant 5.000000e+00 : f32
    %51 = vector.broadcast %cst_27 : f32 to vector<24x128xf32>
    %52 = arith.mulf %51, %1 : vector<24x128xf32>
    %53 = arith.subf %50, %52 : vector<24x128xf32>
    %54 = vector.extract_strided_slice %53 {offsets = [23, 0], sizes = [1, 128], strides = [1, 1]} : vector<24x128xf32> to vector<1x128xf32>
    %55 = vector.extract_strided_slice %53 {offsets = [0, 0], sizes = [23, 128], strides = [1, 1]} : vector<24x128xf32> to vector<23x128xf32>
    %56 = tpu.concatenate %54, %55 in 0 : vector<1x128xf32>, vector<23x128xf32> -> vector<24x128xf32>
    %cst_28 = arith.constant 0.146446615 : f32
    %57 = vector.broadcast %cst_28 : f32 to vector<24x128xf32>
    %58 = arith.mulf %57, %56 : vector<24x128xf32>
    %cst_29 = arith.constant 0.207106784 : f32
    %59 = vector.broadcast %cst_29 : f32 to vector<24x128xf32>
    %60 = arith.mulf %59, %53 : vector<24x128xf32>
    %61 = arith.addf %58, %60 : vector<24x128xf32>
    %62 = vector.extract_strided_slice %53 {offsets = [1, 0], sizes = [23, 128], strides = [1, 1]} : vector<24x128xf32> to vector<23x128xf32>
    %63 = vector.extract_strided_slice %53 {offsets = [0, 0], sizes = [1, 128], strides = [1, 1]} : vector<24x128xf32> to vector<1x128xf32>
    %64 = tpu.concatenate %62, %63 in 0 : vector<23x128xf32>, vector<1x128xf32> -> vector<24x128xf32>
    %cst_30 = arith.constant 0.146446615 : f32
    %65 = vector.broadcast %cst_30 : f32 to vector<24x128xf32>
    %66 = arith.mulf %65, %64 : vector<24x128xf32>
    %67 = arith.addf %61, %66 : vector<24x128xf32>
    %68 = vector.extract_strided_slice %53 {offsets = [0, 127], sizes = [24, 1], strides = [1, 1]} : vector<24x128xf32> to vector<24x1xf32>
    %69 = vector.extract_strided_slice %53 {offsets = [0, 0], sizes = [24, 127], strides = [1, 1]} : vector<24x128xf32> to vector<24x127xf32>
    %70 = tpu.concatenate %68, %69 in 1 : vector<24x1xf32>, vector<24x127xf32> -> vector<24x128xf32>
    %cst_31 = arith.constant 0.146446615 : f32
    %71 = vector.broadcast %cst_31 : f32 to vector<24x128xf32>
    %72 = arith.mulf %71, %70 : vector<24x128xf32>
    %cst_32 = arith.constant 0.207106784 : f32
    %73 = vector.broadcast %cst_32 : f32 to vector<24x128xf32>
    %74 = arith.mulf %73, %53 : vector<24x128xf32>
    %75 = arith.addf %72, %74 : vector<24x128xf32>
    %76 = vector.extract_strided_slice %53 {offsets = [0, 1], sizes = [24, 127], strides = [1, 1]} : vector<24x128xf32> to vector<24x127xf32>
    %77 = vector.extract_strided_slice %53 {offsets = [0, 0], sizes = [24, 1], strides = [1, 1]} : vector<24x128xf32> to vector<24x1xf32>
    %78 = tpu.concatenate %76, %77 in 1 : vector<24x127xf32>, vector<24x1xf32> -> vector<24x128xf32>
    %cst_33 = arith.constant 0.146446615 : f32
    %79 = vector.broadcast %cst_33 : f32 to vector<24x128xf32>
    %80 = arith.mulf %79, %78 : vector<24x128xf32>
    %81 = arith.addf %75, %80 : vector<24x128xf32>
    %82 = vector.extract_strided_slice %67 {offsets = [0, 127], sizes = [24, 1], strides = [1, 1]} : vector<24x128xf32> to vector<24x1xf32>
    %83 = vector.extract_strided_slice %67 {offsets = [0, 0], sizes = [24, 127], strides = [1, 1]} : vector<24x128xf32> to vector<24x127xf32>
    %84 = tpu.concatenate %82, %83 in 1 : vector<24x1xf32>, vector<24x127xf32> -> vector<24x128xf32>
    %85 = vector.extract_strided_slice %67 {offsets = [0, 1], sizes = [24, 127], strides = [1, 1]} : vector<24x128xf32> to vector<24x127xf32>
    %86 = vector.extract_strided_slice %67 {offsets = [0, 0], sizes = [24, 1], strides = [1, 1]} : vector<24x128xf32> to vector<24x1xf32>
    %87 = tpu.concatenate %85, %86 in 1 : vector<24x127xf32>, vector<24x1xf32> -> vector<24x128xf32>
    %88 = vector.extract_strided_slice %81 {offsets = [23, 0], sizes = [1, 128], strides = [1, 1]} : vector<24x128xf32> to vector<1x128xf32>
    %89 = vector.extract_strided_slice %81 {offsets = [0, 0], sizes = [23, 128], strides = [1, 1]} : vector<24x128xf32> to vector<23x128xf32>
    %90 = tpu.concatenate %88, %89 in 0 : vector<1x128xf32>, vector<23x128xf32> -> vector<24x128xf32>
    %91 = vector.extract_strided_slice %81 {offsets = [1, 0], sizes = [23, 128], strides = [1, 1]} : vector<24x128xf32> to vector<23x128xf32>
    %92 = vector.extract_strided_slice %81 {offsets = [0, 0], sizes = [1, 128], strides = [1, 1]} : vector<24x128xf32> to vector<1x128xf32>
    %93 = tpu.concatenate %91, %92 in 0 : vector<23x128xf32>, vector<1x128xf32> -> vector<24x128xf32>
    %cst_34 = arith.constant 0.000000e+00 : f32
    %94 = vector.broadcast %cst_34 : f32 to vector<24x128xf32>
    %95 = arith.cmpf ogt, %47, %94 : vector<24x128xf32>
    %96 = arith.select %95, %84, %12 : vector<24x128xi1>, vector<24x128xf32>
    %cst_35 = arith.constant 0.000000e+00 : f32
    %97 = vector.broadcast %cst_35 : f32 to vector<24x128xf32>
    %98 = arith.cmpf olt, %47, %97 : vector<24x128xf32>
    %99 = arith.select %98, %87, %12 : vector<24x128xi1>, vector<24x128xf32>
    %100 = arith.subf %96, %99 : vector<24x128xf32>
    %cst_36 = arith.constant 0.899999976 : f32
    %101 = vector.broadcast %cst_36 : f32 to vector<24x128xf32>
    %102 = arith.mulf %101, %47 : vector<24x128xf32>
    %103 = arith.subf %100, %102 : vector<24x128xf32>
    %cst_37 = arith.constant 1.000000e+00 : f32
    %104 = vector.broadcast %cst_37 : f32 to vector<24x128xf32>
    %105 = arith.mulf %104, %9 : vector<24x128xf32>
    %106 = arith.addf %103, %105 : vector<24x128xf32>
    %cst_38 = arith.constant 0.000000e+00 : f32
    %107 = vector.broadcast %cst_38 : f32 to vector<24x128xf32>
    %108 = arith.cmpf ogt, %48, %107 : vector<24x128xf32>
    %109 = arith.select %108, %90, %12 : vector<24x128xi1>, vector<24x128xf32>
    %cst_39 = arith.constant 0.000000e+00 : f32
    %110 = vector.broadcast %cst_39 : f32 to vector<24x128xf32>
    %111 = arith.cmpf olt, %48, %110 : vector<24x128xf32>
    %112 = arith.select %111, %93, %12 : vector<24x128xi1>, vector<24x128xf32>
    %113 = arith.subf %109, %112 : vector<24x128xf32>
    %cst_40 = arith.constant 0.899999976 : f32
    %114 = vector.broadcast %cst_40 : f32 to vector<24x128xf32>
    %115 = arith.mulf %114, %48 : vector<24x128xf32>
    %116 = arith.subf %113, %115 : vector<24x128xf32>
    %cst_41 = arith.constant 1.000000e+00 : f32
    %117 = vector.broadcast %cst_41 : f32 to vector<24x128xf32>
    %118 = arith.mulf %117, %11 : vector<24x128xf32>
    %119 = arith.addf %116, %118 : vector<24x128xf32>
    %120 = vector.extract_strided_slice %106 {offsets = [8, 0], sizes = [8, 128], strides = [1, 1]} : vector<24x128xf32> to vector<8x128xf32>
    %c0_42 = arith.constant 0 : index
    %c0_43 = arith.constant 0 : index
    %c0_44 = arith.constant 0 : index
    %121 = vector.load %arg5[%c0_42, %c0_43, %c0_44] : memref<2x8x128xf32, #tpu.memory_space<vmem>>, vector<1x8x128xf32>
    %122 = vector.shape_cast %121 : vector<1x8x128xf32> to vector<8x128xf32>
    %123 = vector.shape_cast %120 : vector<8x128xf32> to vector<1x8x128xf32>
    tpu.vector_store %arg5[%c0_42, %c0_43, %c0_44], %123 {strides = array<i32>} : memref<2x8x128xf32, #tpu.memory_space<vmem>>, vector<1x8x128xf32>,
    %124 = vector.extract_strided_slice %119 {offsets = [8, 0], sizes = [8, 128], strides = [1, 1]} : vector<24x128xf32> to vector<8x128xf32>
    %c1_45 = arith.constant 1 : index
    %c0_46 = arith.constant 0 : index
    %c0_47 = arith.constant 0 : index
    %125 = vector.load %arg5[%c1_45, %c0_46, %c0_47] : memref<2x8x128xf32, #tpu.memory_space<vmem>>, vector<1x8x128xf32>
    %126 = vector.shape_cast %125 : vector<1x8x128xf32> to vector<8x128xf32>
    %127 = vector.shape_cast %124 : vector<8x128xf32> to vector<1x8x128xf32>
    tpu.vector_store %arg5[%c1_45, %c0_46, %c0_47], %127 {strides = array<i32>} : memref<2x8x128xf32, #tpu.memory_space<vmem>>, vector<1x8x128xf32>,
    %cst_48 = arith.constant 0.00999999977 : f32
    %128 = vector.broadcast %cst_48 : f32 to vector<24x128xf32>
    %129 = arith.mulf %106, %128 : vector<24x128xf32>
    %130 = arith.addf %5, %129 : vector<24x128xf32>
    %131 = arith.select %37, %12, %130 : vector<24x128xi1>, vector<24x128xf32>
    %cst_49 = arith.constant 0.00999999977 : f32
    %132 = vector.broadcast %cst_49 : f32 to vector<24x128xf32>
    %133 = arith.mulf %119, %132 : vector<24x128xf32>
    %134 = arith.addf %7, %133 : vector<24x128xf32>
    %135 = arith.select %37, %12, %134 : vector<24x128xi1>, vector<24x128xf32>
    %136 = arith.mulf %131, %131 : vector<24x128xf32>
    %137 = arith.mulf %135, %135 : vector<24x128xf32>
    %138 = arith.addf %136, %137 : vector<24x128xf32>
    %cst_50 = arith.constant 5.000000e+00 : f32
    %139 = vector.broadcast %cst_50 : f32 to vector<24x128xf32>
    %140 = arith.mulf %139, %1 : vector<24x128xf32>
    %cst_51 = arith.constant 0.000000e+00 : f32
    %141 = vector.broadcast %cst_51 : f32 to vector<24x128xf32>
    %142 = arith.cmpf ogt, %138, %141 : vector<24x128xf32>
    %cst_52 = arith.constant 1.000000e+00 : f32
    %143 = vector.broadcast %cst_52 : f32 to vector<24x128xf32>
    %144 = arith.select %142, %138, %143 : vector<24x128xi1>, vector<24x128xf32>
    %145 = math.rsqrt %144 : vector<24x128xf32>
    %146 = arith.mulf %140, %140 : vector<24x128xf32>
    %147 = arith.cmpf ogt, %138, %146 : vector<24x128xf32>
    %cst_53 = arith.constant 5.000000e+00 : f32
    %148 = vector.broadcast %cst_53 : f32 to vector<24x128xf32>
    %149 = arith.mulf %148, %145 : vector<24x128xf32>
    %cst_54 = arith.constant 1.000000e+00 : f32
    %150 = vector.broadcast %cst_54 : f32 to vector<24x128xf32>
    %151 = arith.select %147, %149, %150 : vector<24x128xi1>, vector<24x128xf32>
    %152 = arith.mulf %131, %151 : vector<24x128xf32>
    %153 = arith.mulf %135, %151 : vector<24x128xf32>
    %154 = arith.mulf %152, %46 : vector<24x128xf32>
    %155 = arith.mulf %153, %46 : vector<24x128xf32>
    %cst_55 = arith.constant 0.707106769 : f32
    %156 = vector.broadcast %cst_55 : f32 to vector<24x128xf32>
    %157 = arith.mulf %156, %154 : vector<24x128xf32>
    %cst_56 = arith.constant 0.707106769 : f32
    %158 = vector.broadcast %cst_56 : f32 to vector<24x128xf32>
    %159 = arith.mulf %158, %155 : vector<24x128xf32>
    %160 = arith.addf %157, %159 : vector<24x128xf32>
    %161 = arith.subf %159, %157 : vector<24x128xf32>
    %cst_57 = arith.constant 0.000000e+00 : f32
    %162 = vector.broadcast %cst_57 : f32 to vector<24x128xf32>
    %163 = arith.subf %162, %154 : vector<24x128xf32>
    %164 = arith.subf %157, %159 : vector<24x128xf32>
    %cst_58 = arith.constant 0.000000e+00 : f32
    %165 = vector.broadcast %cst_58 : f32 to vector<24x128xf32>
    %166 = arith.subf %165, %155 : vector<24x128xf32>
    %cst_59 = arith.constant 0.000000e+00 : f32
    %167 = vector.broadcast %cst_59 : f32 to vector<24x128xf32>
    %168 = arith.subf %167, %157 : vector<24x128xf32>
    %169 = arith.subf %168, %159 : vector<24x128xf32>
    %cst_60 = arith.constant 0.000000e+00 : f32
    %170 = vector.broadcast %cst_60 : f32 to vector<24x128xf32>
    %171 = arith.cmpf ogt, %160, %170 : vector<24x128xf32>
    %cst_61 = arith.constant 1.000000e+00 : f32
    %172 = vector.broadcast %cst_61 : f32 to vector<24x128xf32>
    %173 = arith.mulf %160, %172 : vector<24x128xf32>
    %cst_62 = arith.constant 1.000000e-10 : f32
    %174 = vector.broadcast %cst_62 : f32 to vector<24x128xf32>
    %175 = arith.select %171, %173, %174 : vector<24x128xi1>, vector<24x128xf32>
    %cst_63 = arith.constant 0.000000e+00 : f32
    %176 = vector.broadcast %cst_63 : f32 to vector<24x128xf32>
    %177 = arith.cmpf ogt, %155, %176 : vector<24x128xf32>
    %cst_64 = arith.constant 1.000000e+00 : f32
    %178 = vector.broadcast %cst_64 : f32 to vector<24x128xf32>
    %179 = arith.mulf %155, %178 : vector<24x128xf32>
    %cst_65 = arith.constant 1.000000e-10 : f32
    %180 = vector.broadcast %cst_65 : f32 to vector<24x128xf32>
    %181 = arith.select %177, %179, %180 : vector<24x128xi1>, vector<24x128xf32>
    %cst_66 = arith.constant 0.000000e+00 : f32
    %182 = vector.broadcast %cst_66 : f32 to vector<24x128xf32>
    %183 = arith.cmpf ogt, %161, %182 : vector<24x128xf32>
    %cst_67 = arith.constant 1.000000e+00 : f32
    %184 = vector.broadcast %cst_67 : f32 to vector<24x128xf32>
    %185 = arith.mulf %161, %184 : vector<24x128xf32>
    %cst_68 = arith.constant 1.000000e-10 : f32
    %186 = vector.broadcast %cst_68 : f32 to vector<24x128xf32>
    %187 = arith.select %183, %185, %186 : vector<24x128xi1>, vector<24x128xf32>
    %cst_69 = arith.constant 0.000000e+00 : f32
    %188 = vector.broadcast %cst_69 : f32 to vector<24x128xf32>
    %189 = arith.cmpf ogt, %154, %188 : vector<24x128xf32>
    %cst_70 = arith.constant 1.000000e+00 : f32
    %190 = vector.broadcast %cst_70 : f32 to vector<24x128xf32>
    %191 = arith.mulf %154, %190 : vector<24x128xf32>
    %cst_71 = arith.constant 1.000000e-10 : f32
    %192 = vector.broadcast %cst_71 : f32 to vector<24x128xf32>
    %193 = arith.select %189, %191, %192 : vector<24x128xi1>, vector<24x128xf32>
    %cst_72 = arith.constant 0.000000e+00 : f32
    %194 = vector.broadcast %cst_72 : f32 to vector<24x128xf32>
    %195 = arith.cmpf ogt, %163, %194 : vector<24x128xf32>
    %cst_73 = arith.constant 1.000000e+00 : f32
    %196 = vector.broadcast %cst_73 : f32 to vector<24x128xf32>
    %197 = arith.mulf %163, %196 : vector<24x128xf32>
    %cst_74 = arith.constant 1.000000e-10 : f32
    %198 = vector.broadcast %cst_74 : f32 to vector<24x128xf32>
    %199 = arith.select %195, %197, %198 : vector<24x128xi1>, vector<24x128xf32>
    %cst_75 = arith.constant 0.000000e+00 : f32
    %200 = vector.broadcast %cst_75 : f32 to vector<24x128xf32>
    %201 = arith.cmpf ogt, %164, %200 : vector<24x128xf32>
    %cst_76 = arith.constant 1.000000e+00 : f32
    %202 = vector.broadcast %cst_76 : f32 to vector<24x128xf32>
    %203 = arith.mulf %164, %202 : vector<24x128xf32>
    %cst_77 = arith.constant 1.000000e-10 : f32
    %204 = vector.broadcast %cst_77 : f32 to vector<24x128xf32>
    %205 = arith.select %201, %203, %204 : vector<24x128xi1>, vector<24x128xf32>
    %cst_78 = arith.constant 0.000000e+00 : f32
    %206 = vector.broadcast %cst_78 : f32 to vector<24x128xf32>
    %207 = arith.cmpf ogt, %166, %206 : vector<24x128xf32>
    %cst_79 = arith.constant 1.000000e+00 : f32
    %208 = vector.broadcast %cst_79 : f32 to vector<24x128xf32>
    %209 = arith.mulf %166, %208 : vector<24x128xf32>
    %cst_80 = arith.constant 1.000000e-10 : f32
    %210 = vector.broadcast %cst_80 : f32 to vector<24x128xf32>
    %211 = arith.select %207, %209, %210 : vector<24x128xi1>, vector<24x128xf32>
    %cst_81 = arith.constant 0.000000e+00 : f32
    %212 = vector.broadcast %cst_81 : f32 to vector<24x128xf32>
    %213 = arith.cmpf ogt, %169, %212 : vector<24x128xf32>
    %cst_82 = arith.constant 1.000000e+00 : f32
    %214 = vector.broadcast %cst_82 : f32 to vector<24x128xf32>
    %215 = arith.mulf %169, %214 : vector<24x128xf32>
    %cst_83 = arith.constant 1.000000e-10 : f32
    %216 = vector.broadcast %cst_83 : f32 to vector<24x128xf32>
    %217 = arith.select %213, %215, %216 : vector<24x128xi1>, vector<24x128xf32>
    %218 = arith.maximumf %175, %181 : vector<24x128xf32>
    %219 = arith.maximumf %218, %187 : vector<24x128xf32>
    %220 = arith.maximumf %219, %193 : vector<24x128xf32>
    %221 = arith.maximumf %220, %199 : vector<24x128xf32>
    %222 = arith.maximumf %221, %205 : vector<24x128xf32>
    %223 = arith.maximumf %222, %211 : vector<24x128xf32>
    %224 = arith.maximumf %223, %217 : vector<24x128xf32>
    %225 = arith.subf %175, %224 : vector<24x128xf32>
    %226 = math.exp %225 : vector<24x128xf32>
    %227 = arith.subf %181, %224 : vector<24x128xf32>
    %228 = math.exp %227 : vector<24x128xf32>
    %229 = arith.subf %187, %224 : vector<24x128xf32>
    %230 = math.exp %229 : vector<24x128xf32>
    %231 = arith.subf %193, %224 : vector<24x128xf32>
    %232 = math.exp %231 : vector<24x128xf32>
    %cst_84 = arith.constant 1.000000e-10 : f32
    %233 = vector.broadcast %cst_84 : f32 to vector<24x128xf32>
    %234 = arith.subf %233, %224 : vector<24x128xf32>
    %235 = math.exp %234 : vector<24x128xf32>
    %236 = arith.subf %199, %224 : vector<24x128xf32>
    %237 = math.exp %236 : vector<24x128xf32>
    %238 = arith.subf %205, %224 : vector<24x128xf32>
    %239 = math.exp %238 : vector<24x128xf32>
    %240 = arith.subf %211, %224 : vector<24x128xf32>
    %241 = math.exp %240 : vector<24x128xf32>
    %242 = arith.subf %217, %224 : vector<24x128xf32>
    %243 = math.exp %242 : vector<24x128xf32>
    %244 = arith.addf %226, %228 : vector<24x128xf32>
    %245 = arith.addf %244, %230 : vector<24x128xf32>
    %246 = arith.addf %245, %232 : vector<24x128xf32>
    %247 = arith.addf %246, %235 : vector<24x128xf32>
    %248 = arith.addf %247, %237 : vector<24x128xf32>
    %249 = arith.addf %248, %239 : vector<24x128xf32>
    %250 = arith.addf %249, %241 : vector<24x128xf32>
    %251 = arith.addf %250, %243 : vector<24x128xf32>
    %252 = tpu.reciprocal %251 {approx = true} : vector<24x128xf32> -> vector<24x128xf32>
    %253 = arith.mulf %1, %252 : vector<24x128xf32>
    %254 = arith.mulf %152, %252 : vector<24x128xf32>
    %255 = arith.mulf %153, %252 : vector<24x128xf32>
    %256 = arith.mulf %253, %226 : vector<24x128xf32>
    %257 = vector.extract_strided_slice %256 {offsets = [0, 1], sizes = [24, 127], strides = [1, 1]} : vector<24x128xf32> to vector<24x127xf32>
    %258 = vector.extract_strided_slice %256 {offsets = [0, 0], sizes = [24, 1], strides = [1, 1]} : vector<24x128xf32> to vector<24x1xf32>
    %259 = tpu.concatenate %257, %258 in 1 : vector<24x127xf32>, vector<24x1xf32> -> vector<24x128xf32>
    %260 = arith.addf %12, %259 : vector<24x128xf32>
    %261 = arith.mulf %254, %226 : vector<24x128xf32>
    %262 = vector.extract_strided_slice %261 {offsets = [0, 1], sizes = [24, 127], strides = [1, 1]} : vector<24x128xf32> to vector<24x127xf32>
    %263 = vector.extract_strided_slice %261 {offsets = [0, 0], sizes = [24, 1], strides = [1, 1]} : vector<24x128xf32> to vector<24x1xf32>
    %264 = tpu.concatenate %262, %263 in 1 : vector<24x127xf32>, vector<24x1xf32> -> vector<24x128xf32>
    %265 = arith.addf %12, %264 : vector<24x128xf32>
    %266 = arith.mulf %255, %226 : vector<24x128xf32>
    %267 = vector.extract_strided_slice %266 {offsets = [0, 1], sizes = [24, 127], strides = [1, 1]} : vector<24x128xf32> to vector<24x127xf32>
    %268 = vector.extract_strided_slice %266 {offsets = [0, 0], sizes = [24, 1], strides = [1, 1]} : vector<24x128xf32> to vector<24x1xf32>
    %269 = tpu.concatenate %267, %268 in 1 : vector<24x127xf32>, vector<24x1xf32> -> vector<24x128xf32>
    %270 = arith.addf %12, %269 : vector<24x128xf32>
    %271 = arith.mulf %253, %228 : vector<24x128xf32>
    %272 = arith.addf %260, %271 : vector<24x128xf32>
    %273 = arith.mulf %254, %228 : vector<24x128xf32>
    %274 = arith.addf %265, %273 : vector<24x128xf32>
    %275 = arith.mulf %255, %228 : vector<24x128xf32>
    %276 = arith.addf %270, %275 : vector<24x128xf32>
    %277 = arith.mulf %253, %230 : vector<24x128xf32>
    %278 = vector.extract_strided_slice %277 {offsets = [0, 127], sizes = [24, 1], strides = [1, 1]} : vector<24x128xf32> to vector<24x1xf32>
    %279 = vector.extract_strided_slice %277 {offsets = [0, 0], sizes = [24, 127], strides = [1, 1]} : vector<24x128xf32> to vector<24x127xf32>
    %280 = tpu.concatenate %278, %279 in 1 : vector<24x1xf32>, vector<24x127xf32> -> vector<24x128xf32>
    %281 = arith.addf %272, %280 : vector<24x128xf32>
    %282 = arith.mulf %254, %230 : vector<24x128xf32>
    %283 = vector.extract_strided_slice %282 {offsets = [0, 127], sizes = [24, 1], strides = [1, 1]} : vector<24x128xf32> to vector<24x1xf32>
    %284 = vector.extract_strided_slice %282 {offsets = [0, 0], sizes = [24, 127], strides = [1, 1]} : vector<24x128xf32> to vector<24x127xf32>
    %285 = tpu.concatenate %283, %284 in 1 : vector<24x1xf32>, vector<24x127xf32> -> vector<24x128xf32>
    %286 = arith.addf %274, %285 : vector<24x128xf32>
    %287 = arith.mulf %255, %230 : vector<24x128xf32>
    %288 = vector.extract_strided_slice %287 {offsets = [0, 127], sizes = [24, 1], strides = [1, 1]} : vector<24x128xf32> to vector<24x1xf32>
    %289 = vector.extract_strided_slice %287 {offsets = [0, 0], sizes = [24, 127], strides = [1, 1]} : vector<24x128xf32> to vector<24x127xf32>
    %290 = tpu.concatenate %288, %289 in 1 : vector<24x1xf32>, vector<24x127xf32> -> vector<24x128xf32>
    %291 = arith.addf %276, %290 : vector<24x128xf32>
    %292 = vector.extract_strided_slice %281 {offsets = [1, 0], sizes = [23, 128], strides = [1, 1]} : vector<24x128xf32> to vector<23x128xf32>
    %293 = vector.extract_strided_slice %281 {offsets = [0, 0], sizes = [1, 128], strides = [1, 1]} : vector<24x128xf32> to vector<1x128xf32>
    %294 = tpu.concatenate %292, %293 in 0 : vector<23x128xf32>, vector<1x128xf32> -> vector<24x128xf32>
    %295 = arith.addf %12, %294 : vector<24x128xf32>
    %296 = vector.extract_strided_slice %286 {offsets = [1, 0], sizes = [23, 128], strides = [1, 1]} : vector<24x128xf32> to vector<23x128xf32>
    %297 = vector.extract_strided_slice %286 {offsets = [0, 0], sizes = [1, 128], strides = [1, 1]} : vector<24x128xf32> to vector<1x128xf32>
    %298 = tpu.concatenate %296, %297 in 0 : vector<23x128xf32>, vector<1x128xf32> -> vector<24x128xf32>
    %299 = arith.addf %12, %298 : vector<24x128xf32>
    %300 = vector.extract_strided_slice %291 {offsets = [1, 0], sizes = [23, 128], strides = [1, 1]} : vector<24x128xf32> to vector<23x128xf32>
    %301 = vector.extract_strided_slice %291 {offsets = [0, 0], sizes = [1, 128], strides = [1, 1]} : vector<24x128xf32> to vector<1x128xf32>
    %302 = tpu.concatenate %300, %301 in 0 : vector<23x128xf32>, vector<1x128xf32> -> vector<24x128xf32>
    %303 = arith.addf %12, %302 : vector<24x128xf32>
    %304 = arith.mulf %253, %232 : vector<24x128xf32>
    %305 = vector.extract_strided_slice %304 {offsets = [0, 1], sizes = [24, 127], strides = [1, 1]} : vector<24x128xf32> to vector<24x127xf32>
    %306 = vector.extract_strided_slice %304 {offsets = [0, 0], sizes = [24, 1], strides = [1, 1]} : vector<24x128xf32> to vector<24x1xf32>
    %307 = tpu.concatenate %305, %306 in 1 : vector<24x127xf32>, vector<24x1xf32> -> vector<24x128xf32>
    %308 = arith.addf %12, %307 : vector<24x128xf32>
    %309 = arith.mulf %254, %232 : vector<24x128xf32>
    %310 = vector.extract_strided_slice %309 {offsets = [0, 1], sizes = [24, 127], strides = [1, 1]} : vector<24x128xf32> to vector<24x127xf32>
    %311 = vector.extract_strided_slice %309 {offsets = [0, 0], sizes = [24, 1], strides = [1, 1]} : vector<24x128xf32> to vector<24x1xf32>
    %312 = tpu.concatenate %310, %311 in 1 : vector<24x127xf32>, vector<24x1xf32> -> vector<24x128xf32>
    %313 = arith.addf %12, %312 : vector<24x128xf32>
    %314 = arith.mulf %255, %232 : vector<24x128xf32>
    %315 = vector.extract_strided_slice %314 {offsets = [0, 1], sizes = [24, 127], strides = [1, 1]} : vector<24x128xf32> to vector<24x127xf32>
    %316 = vector.extract_strided_slice %314 {offsets = [0, 0], sizes = [24, 1], strides = [1, 1]} : vector<24x128xf32> to vector<24x1xf32>
    %317 = tpu.concatenate %315, %316 in 1 : vector<24x127xf32>, vector<24x1xf32> -> vector<24x128xf32>
    %318 = arith.addf %12, %317 : vector<24x128xf32>
    %319 = arith.mulf %253, %235 : vector<24x128xf32>
    %320 = arith.addf %308, %319 : vector<24x128xf32>
    %321 = arith.mulf %254, %235 : vector<24x128xf32>
    %322 = arith.addf %313, %321 : vector<24x128xf32>
    %323 = arith.mulf %255, %235 : vector<24x128xf32>
    %324 = arith.addf %318, %323 : vector<24x128xf32>
    %325 = arith.mulf %253, %237 : vector<24x128xf32>
    %326 = vector.extract_strided_slice %325 {offsets = [0, 127], sizes = [24, 1], strides = [1, 1]} : vector<24x128xf32> to vector<24x1xf32>
    %327 = vector.extract_strided_slice %325 {offsets = [0, 0], sizes = [24, 127], strides = [1, 1]} : vector<24x128xf32> to vector<24x127xf32>
    %328 = tpu.concatenate %326, %327 in 1 : vector<24x1xf32>, vector<24x127xf32> -> vector<24x128xf32>
    %329 = arith.addf %320, %328 : vector<24x128xf32>
    %330 = arith.mulf %254, %237 : vector<24x128xf32>
    %331 = vector.extract_strided_slice %330 {offsets = [0, 127], sizes = [24, 1], strides = [1, 1]} : vector<24x128xf32> to vector<24x1xf32>
    %332 = vector.extract_strided_slice %330 {offsets = [0, 0], sizes = [24, 127], strides = [1, 1]} : vector<24x128xf32> to vector<24x127xf32>
    %333 = tpu.concatenate %331, %332 in 1 : vector<24x1xf32>, vector<24x127xf32> -> vector<24x128xf32>
    %334 = arith.addf %322, %333 : vector<24x128xf32>
    %335 = arith.mulf %255, %237 : vector<24x128xf32>
    %336 = vector.extract_strided_slice %335 {offsets = [0, 127], sizes = [24, 1], strides = [1, 1]} : vector<24x128xf32> to vector<24x1xf32>
    %337 = vector.extract_strided_slice %335 {offsets = [0, 0], sizes = [24, 127], strides = [1, 1]} : vector<24x128xf32> to vector<24x127xf32>
    %338 = tpu.concatenate %336, %337 in 1 : vector<24x1xf32>, vector<24x127xf32> -> vector<24x128xf32>
    %339 = arith.addf %324, %338 : vector<24x128xf32>
    %340 = arith.addf %295, %329 : vector<24x128xf32>
    %341 = arith.addf %299, %334 : vector<24x128xf32>
    %342 = arith.addf %303, %339 : vector<24x128xf32>
    %343 = arith.mulf %253, %239 : vector<24x128xf32>
    %344 = vector.extract_strided_slice %343 {offsets = [0, 1], sizes = [24, 127], strides = [1, 1]} : vector<24x128xf32> to vector<24x127xf32>
    %345 = vector.extract_strided_slice %343 {offsets = [0, 0], sizes = [24, 1], strides = [1, 1]} : vector<24x128xf32> to vector<24x1xf32>
    %346 = tpu.concatenate %344, %345 in 1 : vector<24x127xf32>, vector<24x1xf32> -> vector<24x128xf32>
    %347 = arith.addf %12, %346 : vector<24x128xf32>
    %348 = arith.mulf %254, %239 : vector<24x128xf32>
    %349 = vector.extract_strided_slice %348 {offsets = [0, 1], sizes = [24, 127], strides = [1, 1]} : vector<24x128xf32> to vector<24x127xf32>
    %350 = vector.extract_strided_slice %348 {offsets = [0, 0], sizes = [24, 1], strides = [1, 1]} : vector<24x128xf32> to vector<24x1xf32>
    %351 = tpu.concatenate %349, %350 in 1 : vector<24x127xf32>, vector<24x1xf32> -> vector<24x128xf32>
    %352 = arith.addf %12, %351 : vector<24x128xf32>
    %353 = arith.mulf %255, %239 : vector<24x128xf32>
    %354 = vector.extract_strided_slice %353 {offsets = [0, 1], sizes = [24, 127], strides = [1, 1]} : vector<24x128xf32> to vector<24x127xf32>
    %355 = vector.extract_strided_slice %353 {offsets = [0, 0], sizes = [24, 1], strides = [1, 1]} : vector<24x128xf32> to vector<24x1xf32>
    %356 = tpu.concatenate %354, %355 in 1 : vector<24x127xf32>, vector<24x1xf32> -> vector<24x128xf32>
    %357 = arith.addf %12, %356 : vector<24x128xf32>
    %358 = arith.mulf %253, %241 : vector<24x128xf32>
    %359 = arith.addf %347, %358 : vector<24x128xf32>
    %360 = arith.mulf %254, %241 : vector<24x128xf32>
    %361 = arith.addf %352, %360 : vector<24x128xf32>
    %362 = arith.mulf %255, %241 : vector<24x128xf32>
    %363 = arith.addf %357, %362 : vector<24x128xf32>
    %364 = arith.mulf %253, %243 : vector<24x128xf32>
    %365 = vector.extract_strided_slice %364 {offsets = [0, 127], sizes = [24, 1], strides = [1, 1]} : vector<24x128xf32> to vector<24x1xf32>
    %366 = vector.extract_strided_slice %364 {offsets = [0, 0], sizes = [24, 127], strides = [1, 1]} : vector<24x128xf32> to vector<24x127xf32>
    %367 = tpu.concatenate %365, %366 in 1 : vector<24x1xf32>, vector<24x127xf32> -> vector<24x128xf32>
    %368 = arith.addf %359, %367 : vector<24x128xf32>
    %369 = arith.mulf %254, %243 : vector<24x128xf32>
    %370 = vector.extract_strided_slice %369 {offsets = [0, 127], sizes = [24, 1], strides = [1, 1]} : vector<24x128xf32> to vector<24x1xf32>
    %371 = vector.extract_strided_slice %369 {offsets = [0, 0], sizes = [24, 127], strides = [1, 1]} : vector<24x128xf32> to vector<24x127xf32>
    %372 = tpu.concatenate %370, %371 in 1 : vector<24x1xf32>, vector<24x127xf32> -> vector<24x128xf32>
    %373 = arith.addf %361, %372 : vector<24x128xf32>
    %374 = arith.mulf %255, %243 : vector<24x128xf32>
    %375 = vector.extract_strided_slice %374 {offsets = [0, 127], sizes = [24, 1], strides = [1, 1]} : vector<24x128xf32> to vector<24x1xf32>
    %376 = vector.extract_strided_slice %374 {offsets = [0, 0], sizes = [24, 127], strides = [1, 1]} : vector<24x128xf32> to vector<24x127xf32>
    %377 = tpu.concatenate %375, %376 in 1 : vector<24x1xf32>, vector<24x127xf32> -> vector<24x128xf32>
    %378 = arith.addf %363, %377 : vector<24x128xf32>
    %379 = vector.extract_strided_slice %368 {offsets = [23, 0], sizes = [1, 128], strides = [1, 1]} : vector<24x128xf32> to vector<1x128xf32>
    %380 = vector.extract_strided_slice %368 {offsets = [0, 0], sizes = [23, 128], strides = [1, 1]} : vector<24x128xf32> to vector<23x128xf32>
    %381 = tpu.concatenate %379, %380 in 0 : vector<1x128xf32>, vector<23x128xf32> -> vector<24x128xf32>
    %382 = arith.addf %340, %381 : vector<24x128xf32>
    %383 = vector.extract_strided_slice %373 {offsets = [23, 0], sizes = [1, 128], strides = [1, 1]} : vector<24x128xf32> to vector<1x128xf32>
    %384 = vector.extract_strided_slice %373 {offsets = [0, 0], sizes = [23, 128], strides = [1, 1]} : vector<24x128xf32> to vector<23x128xf32>
    %385 = tpu.concatenate %383, %384 in 0 : vector<1x128xf32>, vector<23x128xf32> -> vector<24x128xf32>
    %386 = arith.addf %341, %385 : vector<24x128xf32>
    %387 = vector.extract_strided_slice %378 {offsets = [23, 0], sizes = [1, 128], strides = [1, 1]} : vector<24x128xf32> to vector<1x128xf32>
    %388 = vector.extract_strided_slice %378 {offsets = [0, 0], sizes = [23, 128], strides = [1, 1]} : vector<24x128xf32> to vector<23x128xf32>
    %389 = tpu.concatenate %387, %388 in 0 : vector<1x128xf32>, vector<23x128xf32> -> vector<24x128xf32>
    %390 = arith.addf %342, %389 : vector<24x128xf32>
    %391 = vector.extract_strided_slice %382 {offsets = [8, 0], sizes = [8, 128], strides = [1, 1]} : vector<24x128xf32> to vector<8x128xf32>
    %c0_85 = arith.constant 0 : index
    %c0_86 = arith.constant 0 : index
    %c0_87 = arith.constant 0 : index
    %392 = vector.load %arg2[%c0_85, %c0_86, %c0_87] : memref<1x8x128xf32, #tpu.memory_space<vmem>>, vector<1x8x128xf32>
    %393 = vector.shape_cast %392 : vector<1x8x128xf32> to vector<8x128xf32>
    %394 = vector.shape_cast %391 : vector<8x128xf32> to vector<1x8x128xf32>
    tpu.vector_store %arg2[%c0_85, %c0_86, %c0_87], %394 {strides = array<i32>} : memref<1x8x128xf32, #tpu.memory_space<vmem>>, vector<1x8x128xf32>,
    %395 = vector.extract_strided_slice %386 {offsets = [8, 0], sizes = [8, 128], strides = [1, 1]} : vector<24x128xf32> to vector<8x128xf32>
    %c0_88 = arith.constant 0 : index
    %c0_89 = arith.constant 0 : index
    %c0_90 = arith.constant 0 : index
    %396 = vector.load %arg4[%c0_88, %c0_89, %c0_90] : memref<2x8x128xf32, #tpu.memory_space<vmem>>, vector<1x8x128xf32>
    %397 = vector.shape_cast %396 : vector<1x8x128xf32> to vector<8x128xf32>
    %398 = vector.shape_cast %395 : vector<8x128xf32> to vector<1x8x128xf32>
    tpu.vector_store %arg4[%c0_88, %c0_89, %c0_90], %398 {strides = array<i32>} : memref<2x8x128xf32, #tpu.memory_space<vmem>>, vector<1x8x128xf32>,
    %399 = vector.extract_strided_slice %390 {offsets = [8, 0], sizes = [8, 128], strides = [1, 1]} : vector<24x128xf32> to vector<8x128xf32>
    %c1_91 = arith.constant 1 : index
    %c0_92 = arith.constant 0 : index
    %c0_93 = arith.constant 0 : index
    %400 = vector.load %arg4[%c1_91, %c0_92, %c0_93] : memref<2x8x128xf32, #tpu.memory_space<vmem>>, vector<1x8x128xf32>
    %401 = vector.shape_cast %400 : vector<1x8x128xf32> to vector<8x128xf32>
    %402 = vector.shape_cast %399 : vector<8x128xf32> to vector<1x8x128xf32>
    tpu.vector_store %arg4[%c1_91, %c0_92, %c0_93], %402 {strides = array<i32>} : memref<2x8x128xf32, #tpu.memory_space<vmem>>, vector<1x8x128xf32>,
    %403 = vector.extract_strided_slice %1 {offsets = [8, 0], sizes = [8, 128], strides = [1, 1]} : vector<24x128xf32> to vector<8x128xf32>
    %404 = vector.shape_cast %403 : vector<8x128xf32> to vector<1x8x128xf32>
    %cst_94 = arith.constant dense<0.000000e+00> : vector<1xf32>
    %405 = vector.multi_reduction <add>, %404, %cst_94 [1, 2] : vector<1x8x128xf32> to vector<1xf32>
    %406 = vector.shape_cast %405 : vector<1xf32> to vector<1x1x1xf32>
    %407 = vector.extract %406[0, 0, 0] : f32 from vector<1x1x1xf32>
    %408 = vector.extract_strided_slice %382 {offsets = [8, 0], sizes = [8, 128], strides = [1, 1]} : vector<24x128xf32> to vector<8x128xf32>
    %409 = vector.shape_cast %408 : vector<8x128xf32> to vector<1x8x128xf32>
    %cst_95 = arith.constant dense<0.000000e+00> : vector<1xf32>
    %410 = vector.multi_reduction <add>, %409, %cst_95 [1, 2] : vector<1x8x128xf32> to vector<1xf32>
    %411 = vector.shape_cast %410 : vector<1xf32> to vector<1x1x1xf32>
    %412 = vector.extract %411[0, 0, 0] : f32 from vector<1x1x1xf32>
    %413 = tpu.iota {dimensions = array<i32: 0>} : vector<8x128xi32>
    %c4_i32 = arith.constant 4 : i32
    %414 = vector.broadcast %c4_i32 : i32 to vector<8x128xi32>
    %415 = arith.cmpi slt, %413, %414 : vector<8x128xi32>
    %416 = vector.broadcast %407 : f32 to vector<8x128xf32>
    %417 = vector.broadcast %412 : f32 to vector<8x128xf32>
    %418 = arith.select %415, %416, %417 : vector<8x128xi1>, vector<8x128xf32>
    %c0_96 = arith.constant 0 : index
    %c0_97 = arith.constant 0 : index
    %c0_98 = arith.constant 0 : index
    %419 = vector.load %arg6[%c0_96, %c0_97, %c0_98] : memref<1x8x128xf32, #tpu.memory_space<vmem>>, vector<1x8x128xf32>
    %420 = vector.shape_cast %419 : vector<1x8x128xf32> to vector<8x128xf32>
    %421 = vector.shape_cast %418 : vector<8x128xf32> to vector<1x8x128xf32>
    tpu.vector_store %arg6[%c0_96, %c0_97, %c0_98], %421 {strides = array<i32>} : memref<1x8x128xf32, #tpu.memory_space<vmem>>, vector<1x8x128xf32>,
    return
  }
  func.func @transform_0(%arg0: i32) -> (i32, i32, i32, i32) {
    %c0_i32 = arith.constant 0 : i32
    %c0_i32_0 = arith.constant 0 : i32
    %c0_i32_1 = arith.constant 0 : i32
    %c0_i32_2 = arith.constant 0 : i32
    return %c0_i32, %arg0, %c0_i32_0, %c0_i32_1 : i32, i32, i32, i32
  }
  func.func @transform_1(%arg0: i32) -> (i32, i32, i32) {
    %c0_i32 = arith.constant 0 : i32
    %c0_i32_0 = arith.constant 0 : i32
    %c0_i32_1 = arith.constant 0 : i32
    return %c0_i32, %arg0, %c0_i32_0 : i32, i32, i32
  }
  func.func @transform_2(%arg0: i32) -> (i32, i32, i32) {
    %c0_i32 = arith.constant 0 : i32
    %c0_i32_0 = arith.constant 0 : i32
    %c0_i32_1 = arith.constant 0 : i32
    return %c0_i32, %arg0, %c0_i32_0 : i32, i32, i32
  }
  func.func @transform_3(%arg0: i32) -> (i32, i32, i32) {
    %c0_i32 = arith.constant 0 : i32
    %c0_i32_0 = arith.constant 0 : i32
    %c0_i32_1 = arith.constant 0 : i32
    return %c0_i32, %arg0, %c0_i32_0 : i32, i32, i32
  }
  func.func @transform_4(%arg0: i32) -> (i32, i32, i32) {
    %c0_i32 = arith.constant 0 : i32
    %c0_i32_0 = arith.constant 0 : i32
    %c0_i32_1 = arith.constant 0 : i32
    return %c0_i32, %arg0, %c0_i32_0 : i32, i32, i32
  }
  func.func @transform_5(%arg0: i32) -> (i32, i32, i32) {
    %c0_i32 = arith.constant 0 : i32
    %c0_i32_0 = arith.constant 0 : i32
    %c0_i32_1 = arith.constant 0 : i32
    return %arg0, %c0_i32, %c0_i32_0 : i32, i32, i32
  }
}

</mosaic_0001>

<bundles_post_ra>
// kernel: tpu_custom_call.1
= control target key start
LH: loop header
LB: loop body
LE: loop exit
PB: predicated region body
PF: predicated region fallthrough
CT: control target
= control target key end

     0   :  { %8 = vsyncpa [#allocation3], 0  ;;  %s222_s0 = inlined_call_operand.hbm [shape: f32[16,128], index: 0, kind: input, shape index: {}]   ;;  %s223_s1 = inlined_call_operand.hbm [shape: f32[16,128], index: 1, kind: output, shape index: {0}]   ;;  %s224_s2 = inlined_call_operand.hbm [shape: f32[16,128], index: 2, kind: output, shape index: {1}]  }
   0x1   :  { %9 = vsyncpa [#allocation4], 0 }
   0x2   :  { %10 = vsyncpa [#allocation7], 0  ;;  %s156_s9 = smov [#allocation2]   ;;  %s84_s13 = scalar_lea.hbm %s222_s0, 256 }
   0x3   :  { %s16_s10 = sshll.u32 %s156_s9, 4  ;;  %p85_p0 = scmp.ne.s32.totalorder %s222_s0, %s84_s13  ;;  %s17_s10 = int_to_ptr.vmem [resolvable:$true] %s16_s10 }
   0x4   :  { %p88_p1 = scmp.lt.u32.totalorder %s84_s13, %s222_s0 }
   0x6   :  { %p90_p2 = pnand %p88_p1, %p85_p0 }
   0x8   :  { %93 = shalt.err (!%p90_p2)
}
   0x9   :  { %s94_s18 = scalar_lea.vmem %s17_s10, 256  ;;  %p99_p4 = scmp.lt.s32.totalorder %s17_s10, %s17_s10 }
   0xa   :  { %p95_p3 = scmp.ne.s32.totalorder %s17_s10, %s94_s18  ;;  %p100_p5 = scmp.lt.s32.totalorder %s94_s18, %s94_s18 }
   0xc   :  { %p101_p6 = por %p100_p5, %p99_p4 }
   0xe   :  { %p102_p7 = pnand %p101_p6, %p95_p3 }
  0x10   :  { %105 = shalt.err (!%p102_p7)
}
  0x11   :  { %s157_s19 = smov 128   ;;  %s158_s20 = smov 8  }
  0x12   :  { %22 = dma.hbm_to_vmem [thread:$0]  %s222_s0, 256, %s17_s10, [#allocation3], %s157_s19, %s157_s19, %s158_s20  }
  0x13   :  { %150 = dma.done.wait [#allocation3], 256  }
  0x14   :  { %151 = vsyncadd [#allocation3], 4294967040  ;;  %v30_v0 = vlaneseq  ;;  %v37_v2 = vld [vmem:[#allocation2] sm:$0xff]  ;;  %v38_v3 = vld [vmem:[#allocation2 + $0x8] sm:$0xff]  ;;  %s159_s23 = smov [#allocation5]   ;;  %s160_s25 = smov 1  }
  0x15   :  { %s50_s24 = sshll.u32 %s159_s23, 4  ;;  %39 = vrot.lane.b32.xlu0 %v37_v2, %s160_s25  ;;  %v28_v4 = vrot.slane %v37_v2, 7  ;;  %v29_v5 = vrot.slane %v38_v3, 7  ;;  %s51_s24 = int_to_ptr.vmem [resolvable:$true] %s50_s24 }
  0x16   :  { %v31_v1 = vshrl.u32 %v30_v0, 7  ;;  %s106_s0 = scalar_lea.vmem %s51_s24, 256  ;;  %p111_p9 = scmp.lt.s32.totalorder %s51_s24, %s51_s24 }
  0x17   :  { %p107_p8 = scmp.ne.s32.totalorder %s51_s24, %s106_s0  ;;  %p112_p10 = scmp.lt.s32.totalorder %s106_s0, %s106_s0 }
  0x18   :  { %vm32_vm0 = vcmp.lt.s32.totalorder %v31_v1, 1 }
  0x19   :  { %v33_v6 = vsel %vm32_vm0, %v28_v4, %v29_v5  ;;  %v34_v7 = vsel %vm32_vm0, %v29_v5, %v28_v4  ;;  %41 = vrot.lane.b32.xlu0 %v38_v3, %s160_s25  ;;  %p113_p11 = por %p112_p10, %p111_p9 }
  0x1a   :  { %35 = vst [vmem:[#allocation5] sm:$0xff] %v34_v7  ;;  %36 = vst [vmem:[#allocation5 + $0x8] sm:$0xff] %v33_v6 }
  0x1b   :  { %p114_p12 = pnand %p113_p11, %p107_p8 }
  0x1d   :  { %117 = shalt.err (!%p114_p12)
}
  0x1e   :  { %s118_s28 = scalar_lea.hbm %s223_s1, 256 }
  0x1f   :  { %p119_p13 = scmp.ne.s32.totalorder %s223_s1, %s118_s28  ;;  %p122_p0 = scmp.lt.u32.totalorder %s118_s28, %s223_s1 }
  0x21   :  { %p124_p1 = pnand %p122_p0, %p119_p13 }
  0x23   :  { %127 = shalt.err (!%p124_p1)
}
  0x24   :  { %56 = dma.vmem_to_hbm [thread:$0]  %s51_s24, 256, %s223_s1, [#allocation4], %s157_s19, %s157_s19, %s158_s20  }
  0x25   :  { %s161_s7 = smov [#allocation6]  }
  0x26   :  { %s62_s8 = sshll.u32 %s161_s7, 4  ;;  %s63_s8 = int_to_ptr.vmem [resolvable:$true] %s62_s8 }
  0x27   :  { %s128_s9 = scalar_lea.vmem %s63_s8, 256  ;;  %p133_p3 = scmp.lt.s32.totalorder %s63_s8, %s63_s8 }
  0x28   :  { %p129_p2 = scmp.ne.s32.totalorder %s63_s8, %s128_s9  ;;  %p134_p4 = scmp.lt.s32.totalorder %s128_s9, %s128_s9 }
  0x2a   :  { %p135_p5 = por %p134_p4, %p133_p3 }
  0x2c   :  { %p136_p6 = pnand %p135_p5, %p129_p2 }
  0x87   :  { %v40_v8 = vpop.permute.xlu0 %39 }
  0x88   :  { %43 = vst [vmem:[#allocation6] sm:$0xff] %v40_v8 }
  0x8b   :  { %v42_v9 = vpop.permute.xlu0 %41 }
  0x8c   :  { %44 = vst [vmem:[#allocation6 + $0x8] sm:$0xff] %v42_v9 }
  0x8d   :  { %139 = shalt.err (!%p136_p6)
}
  0x8e   :  { %s140_s12 = scalar_lea.hbm %s224_s2, 256 }
  0x8f   :  { %p141_p7 = scmp.ne.s32.totalorder %s224_s2, %s140_s12  ;;  %p144_p8 = scmp.lt.u32.totalorder %s140_s12, %s224_s2 }
  0x91   :  { %p146_p9 = pnand %p144_p8, %p141_p7 }
  0x93   :  { %149 = shalt.err (!%p146_p9)
}
  0x94   :  { %68 = dma.vmem_to_hbm [thread:$0]  %s63_s8, 256, %s224_s2, [#allocation7], %s157_s19, %s157_s19, %s158_s20  }
  0x95   :  { %152 = dma.done.wait [#allocation4], 256  }
  0x96   :  { %153 = vsyncadd [#allocation4], 4294967040 }
  0x97   :  { %154 = dma.done.wait [#allocation7], 256  }
  0x98   :  { %155 = vsyncadd [#allocation7], 4294967040 }
  0x99   :  { %75 = vsyncpa [#allocation3], 1 }
  0x9a   :  { %76 = vsyncpa [#allocation4], 1 }
  0x9b   :  { %77 = vsyncpa [#allocation7], 1 }

// kernel: _rule_forward_impl.1
= control target key start
LH: loop header
LB: loop body
LE: loop exit
PB: predicated region body
PF: predicated region fallthrough
CT: control target
= control target key end

     0   :  { %11 = vsyncpa [#allocation4], 0  ;;  %s2527_s0 = inlined_call_operand.vmem [shape: f32[6,2,24,128], index: 0, kind: input, shape index: {}]   ;;  %s2528_s1 = inlined_call_operand.vmem [shape: f32[1,16,128], index: 1, kind: output, shape index: {0}]   ;;  %s2529_s2 = inlined_call_operand.hbm [shape: f32[1,16,128], index: 2, kind: output, shape index: {1}]   ;;  %s2530_s3 = inlined_call_operand.hbm [shape: f32[2,16,128], index: 3, kind: output, shape index: {2}]   ;;  %s2531_s4 = inlined_call_operand.hbm [shape: f32[2,16,128], index: 4, kind: output, shape index: {3}]   ;;  %s2532_s5 = inlined_call_operand.vmem [shape: f32[2,8,128], index: 5, kind: output, shape index: {4}]  }
   0x1   :  { %13 = vsyncpa [#allocation4 + $0x1], 0 }
   0x2   :  { %14 = vsyncpa [#allocation6], 0 }
   0x3   :  { %16 = vsyncpa [#allocation6 + $0x1], 0  ;;  %s1780_s18 = smov 0   ;;  %s1782_s19 = smov 0  }
   0x4   :  { %s1784_s20 = smov 0   ;;  %s1786_s21 = smov 0  }
   0x5 LB: > { %s1801_s22 = sadd.s32 4294967295, %s1740_s21   ;;  %s2533_s23 = sadd.s32 4294967294, %s1740_s21   ;;  %s1740_s21 = sphi %s1786_s21, %s2542_s21   ;;  %s1736_s20 = sphi %s1784_s20, %s2541_s20   ;;  %s1732_s19 = sphi %s1782_s19, %s2540_s19   ;;  %s1728_s18 = sphi %s1780_s18, %s2539_s18  }
   0x6   : > { %s1805_s24 = sadd.s32 1, %s1740_s21   ;;  %s29_s25 = sadd.s32 1, %s1736_s20 }
   0x7   : > { %s26_s26 = ssub.s32 %s1740_s21, %s1805_s24  ;;  %p36_p0 = scmp.ne.s32.totalorder %s1736_s20, %s1732_s19 }
   0x8   : > { %p27_p1 = scmp.eq.s32.totalorder %s26_s26, 0  ;;  %p37_p2 = scmp.eq.s32.totalorder %s1740_s21, 0 }
   0x9   : > { %p92_p3 = scmp.eq.s32.totalorder %s1801_s22, 1  ;;  %p97_p4 = scmp.ne.s32.totalorder %s1732_s19, %s1728_s18 }
   0xa   : > { %s1817_s27 = scalar_select %p27_p1, %s1736_s20, %s29_s25  }
   0xb   : > { %p38_p5 = por %p37_p2, %p36_p0  ;;  %p1819_p6 = por %p92_p3, %p36_p0 }
   0xc   : > { %p98_p7 = scmp.eq.s32.totalorder %s2533_s23, 1  ;;  %p1449_p9 = scmp.ge.s32.totalorder %s1740_s21, 2 }
   0xe   : > { %p1825_p8 = por %p98_p7, %p97_p4  ;;  %192 = sbr.rel (%p1449_p9) target bundleno = 35 (0x23), region = 16 }
  0x15   : > { %195 = sbr.rel (!%p38_p5) target bundleno = 35 (0x23), region = 20  ;;  %s197_s30 = sand.u32 (%p38_p5), 1, %s1736_s20  }
  0x16   : > { %s1483_s6 = smul.u32 (%p38_p5), 24, %s1740_s21 }
  0x17   : > { %s1482_s7 = smul.u32 (%p38_p5), 144, %s197_s30 }
  0x18   : > { %s1837_s10 = scalar_lea.vmem (%p38_p5), %s2527_s0, %s1483_s6 }
  0x19   : > { %v264_v0 = vld [vmem:[%s1837_s10] sm:$0xff] (%p38_p5)  ;;  %v266_v1 = vld [vmem:[%s1837_s10 + $0x8] sm:$0xff] (%p38_p5)  ;;  %v268_v2 = vld [vmem:[%s1837_s10 + $0x10] sm:$0xff] (%p38_p5)  ;;  %s1842_s11 = scalar_lea.vmem (%p38_p5), [#allocation2], %s1482_s7 }
  0x1a   : > { %265 = vst [vmem:[%s1842_s11] sm:$0xff] (%p38_p5), %v264_v0  ;;  %267 = vst [vmem:[%s1842_s11 + $0x8] sm:$0xff] (%p38_p5), %v266_v1  ;;  %v270_v3 = vld [vmem:[%s1837_s10 + $0x30] sm:$0xff] (%p38_p5)  ;;  %v272_v4 = vld [vmem:[%s1837_s10 + $0x38] sm:$0xff] (%p38_p5) }
  0x1b   : > { %269 = vst [vmem:[%s1842_s11 + $0x10] sm:$0xff] (%p38_p5), %v268_v2  ;;  %v274_v5 = vld [vmem:[%s1837_s10 + $0x40] sm:$0xff] (%p38_p5)  ;;  %271 = vst [vmem:[%s1842_s11 + $0x18] sm:$0xff] (%p38_p5), %v270_v3  ;;  %v278_v7 = vld [vmem:[%s1837_s10 + $0x68] sm:$0xff] (%p38_p5) }
  0x1c   : > { %273 = vst [vmem:[%s1842_s11 + $0x20] sm:$0xff] %v272_v4  ;;  %275 = vst [vmem:[%s1842_s11 + $0x28] sm:$0xff] %v274_v5  ;;  %v276_v6 = vld [vmem:[%s1837_s10 + $0x60] sm:$0xff]  ;;  %v280_v8 = vld [vmem:[%s1837_s10 + $0x70] sm:$0xff] }
  0x1d   : > { %277 = vst [vmem:[%s1842_s11 + $0x30] sm:$0xff] %v276_v6  ;;  %279 = vst [vmem:[%s1842_s11 + $0x38] sm:$0xff] %v278_v7  ;;  %v282_v9 = vld [vmem:[%s1837_s10 + $0x90] sm:$0xff]  ;;  %v284_v10 = vld [vmem:[%s1837_s10 + $0x98] sm:$0xff] }
  0x1e   : > { %281 = vst [vmem:[%s1842_s11 + $0x40] sm:$0xff] %v280_v8  ;;  %v286_v11 = vld [vmem:[%s1837_s10 + $0xa0] sm:$0xff]  ;;  %283 = vst [vmem:[%s1842_s11 + $0x48] sm:$0xff] %v282_v9  ;;  %v290_v13 = vld [vmem:[%s1837_s10 + $0xc8] sm:$0xff] }
  0x1f   : > { %285 = vst [vmem:[%s1842_s11 + $0x50] sm:$0xff] %v284_v10  ;;  %287 = vst [vmem:[%s1842_s11 + $0x58] sm:$0xff] %v286_v11  ;;  %v288_v12 = vld [vmem:[%s1837_s10 + $0xc0] sm:$0xff]  ;;  %v292_v14 = vld [vmem:[%s1837_s10 + $0xd0] sm:$0xff] }
  0x20   : > { %289 = vst [vmem:[%s1842_s11 + $0x60] sm:$0xff] %v288_v12  ;;  %291 = vst [vmem:[%s1842_s11 + $0x68] sm:$0xff] %v290_v13  ;;  %v294_v15 = vld [vmem:[%s1837_s10 + $0xf0] sm:$0xff]  ;;  %v296_v16 = vld [vmem:[%s1837_s10 + $0xf8] sm:$0xff] }
  0x21   : > { %293 = vst [vmem:[%s1842_s11 + $0x70] sm:$0xff] %v292_v14  ;;  %v298_v17 = vld [vmem:[%s1837_s10 + $0x100] sm:$0xff]  ;;  %295 = vst [vmem:[%s1842_s11 + $0x78] sm:$0xff] %v294_v15 }
  0x22   : > { %297 = vst [vmem:[%s1842_s11 + $0x80] sm:$0xff] %v296_v16  ;;  %299 = vst [vmem:[%s1842_s11 + $0x88] sm:$0xff] %v298_v17 }
  0x23 PF: > { %p1451_p10 = scmp.ge.s32.totalorder %s1740_s21, 1  ;;  %p304_p11 = scmp.lt.s32.totalorder %s1740_s21, 3 }
  0x25   : > { %p305_p12 = pnand %p1451_p10, %p304_p11 }
  0x26   : > { %s1880_s12 = sand.u32 (!%p305_p12), 1, %s1732_s19   ;;  %vm395_vm0 = vcmask (!%p305_p12), 1040384   ;;  %vm407_vm1 = vcmask (!%p305_p12), 1046528   ;;  %s1742_s15 = smov (!%p305_p12), 1  }
  0x27   : > { %308 = sbr.rel (%p305_p12) target bundleno = 811 (0x32b), region = 58  ;;  %s1743_s16 = smov (!%p305_p12), 127  }
  0x28   : > { %s1484_s13 = smul.u32 (!%p305_p12), 144, %s1880_s12  ;;  %s1452_s17 = sshll.u32 (!%p305_p12), %s1880_s12, 3 }
  0x29   : > { %s1925_s25 = scalar_lea.vmem (!%p305_p12), [#allocation3], %s1452_s17  ;;  %s1453_s26 = sshll.u32 (!%p305_p12), %s1880_s12, 4 }
  0x2a   : > { %s1883_s14 = scalar_lea.vmem (!%p305_p12), [#allocation2], %s1484_s13  ;;  %s2033_s30 = scalar_lea.vmem (!%p305_p12), [#allocation7], %s1453_s26 }
  0x2b   : > { %v1886_v18 = vld [vmem:[%s1883_s14] sm:$0xff] (!%p305_p12)  ;;  %v1889_v19 = vld [vmem:[%s1883_s14 + $0x8] sm:$0xff] (!%p305_p12)  ;;  %v1892_v20 = vld [vmem:[%s1883_s14 + $0x10] sm:$0xff] (!%p305_p12)  ;;  %p356_p13 = scmp.lt.s32.totalorder (!%p305_p12), %s1801_s22, 1  ;;  %s2389_s11 = sshll.u32 (!%p305_p12), %s1801_s22, 7 }
  0x2c   : > { %v1457_v21 = vld [vmem:[%s1883_s14 + $0x18] sm:$0xff] (!%p305_p12)  ;;  %v1458_v22 = vld [vmem:[%s1883_s14 + $0x20] sm:$0xff] (!%p305_p12)  ;;  %v1459_v23 = vld [vmem:[%s1883_s14 + $0x28] sm:$0xff] (!%p305_p12)  ;;  %v1913_v49 = vmul.f32 (!%p305_p12), 5.0, %v1886_v18  ;;  %v1918_v57 = vmul.f32 (!%p305_p12), 5.0, %v1892_v20  ;;  %v1921_v60 = vmul.f32 (!%p305_p12), 5.0, %v1889_v19 }
  0x2d   : > { %v387_v24 = vadd.f32 (!%p305_p12), %v1457_v21, %v1886_v18  ;;  %v388_v25 = vadd.f32 (!%p305_p12), %v1458_v22, %v1889_v19  ;;  %v389_v26 = vadd.f32 (!%p305_p12), %v1459_v23, %v1892_v20  ;;  %vm453_vm2 = vcmp.lt.f32.partialorder (!%p305_p12), %v1889_v19, 1e-08  ;;  %s1240_s17 = sshll.u32 (!%p305_p12), %s1925_s25, 4  ;;  %s1210_s8 = scalar_lea.sflag (!%p305_p12), [#allocation4], %s1880_s12  ;;  %s1241_s17 = int_to_ptr.vmem [resolvable:$true] %s1240_s17 }
  0x2e   : > { %vm452_vm3 = vcmp.lt.f32.partialorder %v1886_v18, 1e-08  ;;  %vm454_vm4 = vcmp.lt.f32.partialorder %v1892_v20, 1e-08  ;;  %s2358_s6 = scalar_select %p356_p13, %s1801_s22, 1 }
  0x2f   : > { %v391_v27 = vrot.slane %v389_v26, 7  ;;  %v397_v28 = vrot.slane %v388_v25, 7  ;;  %v408_v29 = vrot.slane %v387_v24, 1  ;;  %v411_v30 = vrot.slane %v389_v26, 1  ;;  %s1618_s9 = scalar_lea.vmem %s1241_s17, 128 }
  0x30   : > { %v396_v31 = vrot.slane %v387_v24, 7  ;;  %v409_v32 = vrot.slane %v388_v25, 1  ;;  %s2534_s7 = sshll.u32 %s2358_s6, 3  ;;  %p1619_p0 = scmp.ne.s32.totalorder %s1241_s17, %s1618_s9 }
  0x31   : > { %v399_v33 = vsel %vm395_vm0, %v397_v28, %v391_v27  ;;  %v417_v34 = vsel %vm407_vm1, %v411_v30, %v408_v29  ;;  %s359_s10 = scalar_lea.vmem %s2528_s1, %s2534_s7 }
  0x32   : > { %v406_v35 = vadd.f32 %v399_v33, %v389_v26  ;;  %v403_v36 = vsel %vm395_vm0, %v391_v27, %v396_v31  ;;  %v410_v37 = vsel %vm407_vm1, %v408_v29, %v409_v32  ;;  %v398_v38 = vsel %vm395_vm0, %v396_v31, %v397_v28  ;;  %p1620_p1 = pnand %p1619_p0, %p1819_p6 }
  0x33   : > { %v404_v39 = vadd.f32 %v403_v36, %v387_v24  ;;  %v405_v40 = vadd.f32 %v398_v38, %v388_v25  ;;  %v412_v42 = vsel %vm407_vm1, %v409_v32, %v411_v30  ;;  %v456_v32 = vsel %vm453_vm2, 1.0, %v1889_v19 }
  0x34   : > { %v420_v41 = vadd.f32 %v417_v34, %v406_v35  ;;  %v455_v33 = vsel %vm452_vm3, 1.0, %v1886_v18  ;;  %1543 = vrcp.f32 %v456_v32  ;;  %v457_v34 = vsel %vm454_vm4, 1.0, %v1892_v20  ;;  %p1621_p2 = pneg %p1620_p1 }
  0x35   : > { %v418_v43 = vadd.f32 %v410_v37, %v404_v39  ;;  %v419_v44 = vadd.f32 %v412_v42, %v405_v40  ;;  %1545 = vrcp.f32 %v455_v33  ;;  %v686_v18 = vmul.f32 %v1918_v57, %v1918_v57 }
  0x36   : > { %428 = vrot.lane.b32.xlu1 %v420_v41, %s1742_s15  ;;  %1547 = vrcp.f32 %v457_v34 }
  0x37   : > { %424 = vrot.lane.b32.xlu0 %v418_v43, %s1742_s15 }
  0x3a   : > { %436 = vrot.lane.b32.xlu1 %v418_v43, %s1743_s16 }
  0x3b   : > { %426 = vrot.lane.b32.xlu0 %v419_v44, %s1742_s15 }
  0x3e   : > { %440 = vrot.lane.b32.xlu1 %v420_v41, %s1743_s16  ;;  %v1544_v35 = vpop.eup %1543 }
  0x3f   : > { %438 = vrot.lane.b32.xlu0 %v419_v44, %s1743_s16  ;;  %v1546_v36 = vpop.eup %1545  ;;  %v462_v37 = vmul.f32 %v1544_v35, %v456_v32 }
  0x40   : > { %v1548_v38 = vpop.eup %1547  ;;  %v461_v39 = vmul.f32 %v1546_v36, %v455_v33 }
  0x41   : > { %v465_v40 = vsub.f32 2.0, %v462_v37 }
  0x42   : > { %v464_v42 = vsub.f32 2.0, %v461_v39 }
  0xa8   : > { %v429_v45 = vpop.permute.xlu1 %428 }
  0xa9   : > { %v425_v46 = vpop.permute.xlu0 %424  ;;  %v435_v52 = vadd.f32 %v429_v45, %v420_v41  ;;  %v463_v41 = vmul.f32 %v1548_v38, %v457_v34 }
  0xaa   : > { %v433_v47 = vadd.f32 %v425_v46, %v418_v43  ;;  %v467_v46 = vmul.f32 %v1546_v36, %v464_v42 }
  0xab   : > { %v466_v45 = vsub.f32 2.0, %v463_v41 }
  0xac   : > { %v437_v48 = vpop.permute.xlu1 %436 }
  0xad   : > { %v445_v50 = vadd.f32 %v437_v48, %v433_v47  ;;  %v427_v51 = vpop.permute.xlu0 %426 }
  0xae   : > { %v434_v54 = vadd.f32 %v427_v51, %v419_v44  ;;  %v468_v44 = vmul.f32 %v1544_v35, %v465_v40  ;;  %v1969_v51 = vld [vmem:[%s1883_s14 + $0x38] sm:$0xff] }
  0xaf   : > { %v448_v53 = vmul.f32 0.011111111, %v445_v50  ;;  %v469_v50 = vmul.f32 %v1548_v38, %v466_v45 }
  0xb0   : > { %v441_v55 = vpop.permute.xlu1 %440  ;;  %v1966_v48 = vsel %vm453_vm2, 0.0, %v468_v44 }
  0xb1   : > { %v482_v56 = vsub.f32 %v448_v53, %v1913_v49  ;;  %v447_v58 = vadd.f32 %v441_v55, %v435_v52  ;;  %v439_v59 = vpop.permute.xlu0 %438  ;;  %v1972_v53 = vld [vmem:[%s1883_s14 + $0x48] sm:$0xff]  ;;  %v1979_v55 = vsel %vm452_vm3, 0.0, %v467_v46 }
  0xb2   : > { %v446_v61 = vadd.f32 %v439_v59, %v434_v54  ;;  %v1975_v54 = vld [vmem:[%s1883_s14 + $0x50] sm:$0xff]  ;;  %v1982_v59 = vld [vmem:[%s1883_s14 + $0x58] sm:$0xff] }
  0xb3   : > { %v450_v62 = vmul.f32 0.011111111, %v447_v58  ;;  %523 = vrot.lane.b32.xlu0 %v482_v56, %s1742_s15  ;;  %v490_v4 = vrot.slane %v482_v56, 7  ;;  %v507_v10 = vrot.slane %v482_v56, 1  ;;  %v501_v26 = vmul.f32 0.20710678, %v482_v56 }
  0xb4   : > { %v449_v63 = vmul.f32 0.011111111, %v446_v61  ;;  %v474_v61 = vmul.f32 %v1969_v51, %v1966_v48 }
  0xb5   : > { %v484_v0 = vsub.f32 %v450_v62, %v1918_v57  ;;  %v476_v62 = vmul.f32 %v1972_v53, %v1979_v55 }
  0xb6   : > { %451 = vst [vmem:[%s1925_s25] sm:$0xff] %v449_v63  ;;  %v483_v1 = vsub.f32 %v449_v63, %v1921_v60  ;;  %v477_v63 = vmul.f32 %v1975_v54, %v1966_v48  ;;  %vm598_vm5 = vcmp.gt.f32.partialorder %v474_v61, 0.0  ;;  %vm604_vm12 = vcmp.lt.f32.partialorder %v474_v61, 0.0 }
  0xb7   : > { %527 = vrot.lane.b32.xlu0 %v484_v0, %s1742_s15  ;;  %v510_v2 = vrot.slane %v484_v0, 1  ;;  %v486_v3 = vrot.slane %v484_v0, 7  ;;  %v1938_v14 = vmul.f32 0.20710678, %v484_v0  ;;  %vm627_vm7 = vcmp.lt.f32.partialorder %v476_v62, 0.0 }
  0xb8   : > { %525 = vrot.lane.b32.xlu1 %v483_v1, %s1742_s15  ;;  %v491_v5 = vrot.slane %v483_v1, 7  ;;  %v508_v6 = vrot.slane %v483_v1, 1  ;;  %v1935_v12 = vmul.f32 0.20710678, %v483_v1  ;;  %vm622_vm6 = vcmp.gt.f32.partialorder %v477_v63, 0.0 }
  0xb9   : > { %v497_v15 = vsel %vm395_vm0, %v486_v3, %v490_v4  ;;  %v516_v21 = vsel %vm407_vm1, %v510_v2, %v507_v10  ;;  %vm621_vm8 = vcmp.gt.f32.partialorder %v476_v62, 0.0  ;;  %vm628_vm10 = vcmp.lt.f32.partialorder %v477_v63, 0.0 }
  0xba   : > { %v492_v7 = vsel %vm395_vm0, %v490_v4, %v491_v5  ;;  %v511_v8 = vsel %vm407_vm1, %v508_v6, %v510_v2  ;;  %v493_v9 = vsel %vm395_vm0, %v491_v5, %v486_v3  ;;  %v498_v24 = vmul.f32 0.14644662, %v497_v15  ;;  %v1995_v2 = vld [vmem:[%s1883_s14 + $0x40] sm:$0xff] }
  0xbb   : > { %540 = vrot.lane.b32.xlu0 %v483_v1, %s1743_s16  ;;  %v499_v11 = vmul.f32 0.14644662, %v492_v7  ;;  %v500_v13 = vmul.f32 0.14644662, %v493_v9  ;;  %v518_v17 = vmul.f32 0.14644662, %v511_v8  ;;  %v509_v28 = vsel %vm407_vm1, %v507_v10, %v508_v6 }
  0xbc   : > { %538 = vrot.lane.b32.xlu1 %v482_v56, %s1743_s16  ;;  %v519_v25 = vmul.f32 0.14644662, %v516_v21  ;;  %v504_v29 = vadd.f32 %v501_v26, %v498_v24  ;;  %v517_v30 = vmul.f32 0.14644662, %v509_v28  ;;  %v1992_v1 = vsel %vm454_vm4, 0.0, %v469_v50 }
  0xbd   : > { %v505_v16 = vadd.f32 %v1935_v12, %v499_v11  ;;  %v506_v22 = vadd.f32 %v1938_v14, %v500_v13  ;;  %v478_v6 = vmul.f32 %v1982_v59, %v1992_v1  ;;  %v475_v11 = vmul.f32 %v1995_v2, %v1992_v1 }
  0xbe   : > { %v520_v31 = vadd.f32 %v517_v30, %v504_v29  ;;  %v613_v33 = vmul.f32 0.9, %v474_v61 }
  0xbf   : > { %v521_v23 = vadd.f32 %v518_v17, %v505_v16  ;;  %v522_v27 = vadd.f32 %v519_v25, %v506_v22  ;;  %vm623_vm9 = vcmp.gt.f32.partialorder %v478_v6, 0.0  ;;  %vm629_vm11 = vcmp.lt.f32.partialorder %v478_v6, 0.0 }
  0xc0   : > { %542 = vrot.lane.b32.xlu1 %v484_v0, %s1743_s16  ;;  %v636_v25 = vmul.f32 0.9, %v476_v62  ;;  %vm599_vm13 = vcmp.gt.f32.partialorder %v475_v11, 0.0  ;;  %vm605_vm14 = vcmp.lt.f32.partialorder %v475_v11, 0.0  ;;  %v614_v36 = vmul.f32 0.9, %v475_v11 }
  0xc1   : > { %558 = vrot.lane.b32.xlu0 %v521_v23, %s1742_s15  ;;  %v1470_v62 = vld [vmem:[%s1883_s14 + $0x80] sm:$0xff] }
  0xc4   : > { %560 = vrot.lane.b32.xlu1 %v522_v27, %s1742_s15 }
  0xc5   : > { %567 = vrot.lane.b32.xlu0 %v521_v23, %s1743_s16 }
  0xc8   : > { %569 = vrot.lane.b32.xlu1 %v522_v27, %s1743_s16  ;;  %v2004_v27 = vld [vmem:[%s1883_s14 + $0x30] sm:$0xff] }
  0xc9   : > { %556 = vrot.lane.b32.xlu0 %v520_v31, %s1742_s15  ;;  %v473_v37 = vmul.f32 %v2004_v27, %v1979_v55 }
  0xcb   : > { %vm597_vm15 = vcmp.gt.f32.partialorder %v473_v37, 0.0 }
  0xcc   : > { %565 = vrot.lane.b32.xlu1 %v520_v31, %s1743_s16  ;;  %v638_v31 = vmul.f32 0.9, %v478_v6 }
 0x125   : > { %v524_v43 = vpop.permute.xlu0 %523 }
 0x126   : > { %v532_v56 = vmul.f32 0.14644662, %v524_v43 }
 0x128   : > { %v535_v7 = vadd.f32 %v532_v56, %v501_v26  ;;  %v637_v26 = vmul.f32 0.9, %v477_v63 }
 0x129   : > { %v528_v47 = vpop.permute.xlu0 %527 }
 0x12a   : > { %v526_v52 = vpop.permute.xlu1 %525  ;;  %v534_v8 = vmul.f32 0.14644662, %v528_v47 }
 0x12b   : > { %v533_v58 = vmul.f32 0.14644662, %v526_v52 }
 0x12c   : > { %v537_v17 = vadd.f32 %v534_v8, %v1938_v14 }
 0x12d   : > { %v541_v0 = vpop.permute.xlu0 %540  ;;  %v536_v3 = vadd.f32 %v533_v58, %v1935_v12  ;;  %v1471_v58 = vld [vmem:[%s1883_s14 + $0x88] sm:$0xff] }
 0x12e   : > { %v539_v4 = vpop.permute.xlu1 %538  ;;  %v548_v5 = vmul.f32 0.14644662, %v541_v0 }
 0x12f   : > { %v547_v9 = vmul.f32 0.14644662, %v539_v4 }
 0x130   : > { %v551_v10 = vadd.f32 %v548_v5, %v536_v3 }
 0x131   : > { %v550_v13 = vadd.f32 %v547_v9, %v535_v7  ;;  %v1467_v7 = vld [vmem:[%s1883_s14 + $0x68] sm:$0xff] }
 0x132   : > { %v580_v15 = vrot.slane %v551_v10, 7  ;;  %v588_v12 = vrot.slane %v551_v10, 1  ;;  %v543_v16 = vpop.permute.xlu1 %542 }
 0x133   : > { %v579_v21 = vrot.slane %v550_v13, 7  ;;  %v587_v22 = vrot.slane %v550_v13, 1  ;;  %v549_v23 = vmul.f32 0.14644662, %v543_v16  ;;  %v559_v24 = vpop.permute.xlu0 %558 }
 0x134   : > { %v601_v40 = vsel %vm598_vm5, %v559_v24, 0.0  ;;  %vm603_vm5 = vcmp.lt.f32.partialorder %v473_v37, 0.0  ;;  %v612_v24 = vmul.f32 0.9, %v473_v37 }
 0x135   : > { %v581_v28 = vsel %vm395_vm0, %v579_v21, %v580_v15  ;;  %v589_v29 = vsel %vm407_vm1, %v587_v22, %v588_v12  ;;  %v552_v30 = vadd.f32 %v549_v23, %v537_v17  ;;  %v1468_v23 = vld [vmem:[%s1883_s14 + $0x70] sm:$0xff] }
 0x136   : > { %v561_v32 = vpop.permute.xlu1 %560  ;;  %v625_v38 = vsel %vm622_vm6, %v581_v28, 0.0  ;;  %v630_v39 = vsel %vm627_vm7, %v589_v29, 0.0 }
 0x137   : > { %v575_v14 = vrot.slane %v552_v30, 7  ;;  %v590_v34 = vrot.slane %v552_v30, 1  ;;  %v568_v35 = vpop.permute.xlu0 %567  ;;  %v602_v5 = vsel %vm599_vm13, %v561_v32, 0.0 }
 0x138   : > { %v607_v41 = vsel %vm604_vm12, %v568_v35, 0.0 }
 0x139   : > { %v582_v42 = vsel %vm395_vm0, %v580_v15, %v575_v14  ;;  %v586_v43 = vsel %vm395_vm0, %v575_v14, %v579_v21  ;;  %v591_v44 = vsel %vm407_vm1, %v588_v12, %v590_v34  ;;  %v596_v45 = vsel %vm407_vm1, %v590_v34, %v587_v22  ;;  %v1469_v15 = vld [vmem:[%s1883_s14 + $0x78] sm:$0xff]  ;;  %v1466_v14 = vld [vmem:[%s1883_s14 + $0x60] sm:$0xff] }
 0x13a   : > { %v624_v46 = vsel %vm621_vm8, %v586_v43, 0.0  ;;  %v626_v47 = vsel %vm623_vm9, %v582_v42, 0.0  ;;  %v631_v50 = vsel %vm628_vm10, %v591_v44, 0.0  ;;  %v632_v52 = vsel %vm629_vm11, %v596_v45, 0.0  ;;  %v570_v56 = vpop.permute.xlu1 %569 }
 0x13b   : > { %v633_v61 = vsub.f32 %v624_v46, %v630_v39  ;;  %v634_v0 = vsub.f32 %v625_v38, %v631_v50  ;;  %v635_v3 = vsub.f32 %v626_v47, %v632_v52  ;;  %v610_v4 = vsub.f32 %v601_v40, %v607_v41  ;;  %v557_v13 = vpop.permute.xlu0 %556 }
 0x13c   : > { %v608_v8 = vsel %vm605_vm14, %v570_v56, 0.0  ;;  %v600_v11 = vsel %vm597_vm15, %v557_v13, 0.0 }
 0x13d   : > { %v639_v63 = vsub.f32 %v633_v61, %v636_v25  ;;  %v640_v6 = vsub.f32 %v634_v0, %v637_v26  ;;  %v641_v9 = vsub.f32 %v635_v3, %v638_v31  ;;  %v616_v10 = vsub.f32 %v610_v4, %v613_v33 }
 0x13e   : > { %v611_v12 = vsub.f32 %v602_v5, %v608_v8  ;;  %v566_v16 = vpop.permute.xlu1 %565  ;;  %v685_v4 = vmul.f32 %v1921_v60, %v1921_v60 }
 0x13f   : > { %v644_v17 = vadd.f32 %v1471_v58, %v641_v9  ;;  %v643_v21 = vadd.f32 %v1470_v62, %v640_v6  ;;  %v619_v22 = vadd.f32 %v1467_v7, %v616_v10  ;;  %v606_v29 = vsel %vm603_vm5, %v566_v16, 0.0 }
 0x140   : > { %v617_v28 = vsub.f32 %v611_v12, %v614_v36  ;;  %v642_v25 = vadd.f32 %v1469_v15, %v639_v63  ;;  %v609_v31 = vsub.f32 %v600_v11, %v606_v29 }
 0x141   : > { %v659_v26 = vmul.f32 0.01, %v644_v17  ;;  %1472 = vst [vmem:[%s2033_s30 + $0x8] sm:$0xff] %v643_v21  ;;  %v658_v30 = vmul.f32 0.01, %v643_v21  ;;  %645 = vst [vmem:[%s2033_s30] sm:$0xff] %v619_v22 }
 0x142   : > { %v649_v32 = vmul.f32 0.01, %v619_v22  ;;  %v620_v33 = vadd.f32 %v1468_v23, %v617_v28  ;;  %v615_v36 = vsub.f32 %v609_v31, %v612_v24  ;;  %v657_v39 = vmul.f32 0.01, %v642_v25 }
 0x143   : > { %v661_v34 = vadd.f32 %v1975_v54, %v658_v30  ;;  %v662_v35 = vadd.f32 %v1982_v59, %v659_v26  ;;  %v684_v30 = vmul.f32 %v1913_v49, %v1913_v49 }
 0x144   : > { %v652_v37 = vadd.f32 %v1969_v51, %v649_v32  ;;  %v650_v38 = vmul.f32 0.01, %v620_v33  ;;  %v618_v42 = vadd.f32 %v1466_v14, %v615_v36  ;;  %v660_v56 = vadd.f32 %v1972_v53, %v657_v39 }
 0x145   : > { %v664_v40 = vsel %vm453_vm2, 0.0, %v661_v34  ;;  %v665_v41 = vsel %vm454_vm4, 0.0, %v662_v35 }
 0x146   : > { %v670_v43 = vmul.f32 %v664_v40, %v664_v40  ;;  %v655_v44 = vsel %vm453_vm2, 0.0, %v652_v37  ;;  %v653_v54 = vadd.f32 %v1995_v2, %v650_v38  ;;  %v671_v59 = vmul.f32 %v665_v41, %v665_v41 }
 0x147   : > { %v667_v45 = vmul.f32 %v655_v44, %v655_v44  ;;  %v648_v46 = vmul.f32 0.01, %v618_v42  ;;  %v2058_v2 = vsel %vm452_vm3, 0.0, %v660_v56 }
 0x148   : > { %v656_v51 = vsel %vm454_vm4, 0.0, %v653_v54  ;;  %v669_v53 = vmul.f32 %v2058_v2, %v2058_v2 }
 0x149   : > { %v673_v47 = vadd.f32 %v670_v43, %v667_v45  ;;  %v668_v50 = vmul.f32 %v656_v51, %v656_v51  ;;  %v651_v52 = vadd.f32 %v2004_v27, %v648_v46 }
 0x14b   : > { %vm676_vm6 = vcmp.gt.f32.partialorder %v673_v47, 0.0  ;;  %v674_v58 = vadd.f32 %v671_v59, %v668_v50  ;;  %v2054_v61 = vsel %vm452_vm3, 0.0, %v651_v52  ;;  %vm688_vm3 = vcmp.gt.f32.partialorder %v673_v47, %v685_v4 }
 0x14c   : > { %v679_v0 = vsel %vm676_vm6, %v673_v47, 1.0  ;;  %v666_v3 = vmul.f32 %v2054_v61, %v2054_v61 }
 0x14d   : > { %1549 = vrsqrt.f32 %v679_v0  ;;  %vm677_vm2 = vcmp.gt.f32.partialorder %v674_v58, 0.0  ;;  %vm689_vm7 = vcmp.gt.f32.partialorder %v674_v58, %v686_v18 }
 0x14e   : > { %v680_v20 = vsel %vm677_vm2, %v674_v58, 1.0  ;;  %v2064_v27 = vadd.f32 %v669_v53, %v666_v3 }
 0x14f   : > { %1551 = vrsqrt.f32 %v680_v20 }
 0x150   : > { %vm675_vm4 = vcmp.gt.f32.partialorder %v2064_v27, 0.0  ;;  %vm687_vm5 = vcmp.gt.f32.partialorder %v2064_v27, %v684_v30 }
 0x151   : > { %v678_v8 = vsel %vm675_vm4, %v2064_v27, 1.0 }
 0x152   : > { %1553 = vrsqrt.f32 %v678_v8 }
 0x157   : > { %v1550_v5 = vpop.eup %1549 }
 0x158   : > { %v691_v7 = vmul.f32 5.0, %v1550_v5 }
 0x159   : > { %v1552_v62 = vpop.eup %1551 }
 0x15a   : > { %v694_v63 = vsel %vm688_vm3, %v691_v7, 1.0  ;;  %v692_v6 = vmul.f32 5.0, %v1552_v62 }
 0x15b   : > { %v2072_v9 = vmul.f32 %v694_v63, %v655_v44  ;;  %v2074_v10 = vmul.f32 %v694_v63, %v664_v40 }
 0x15c   : > { %v695_v13 = vsel %vm689_vm7, %v692_v6, 1.0  ;;  %v1554_v32 = vpop.eup %1553 }
 0x15d   : > { %v703_v60 = vmul.f32 %v2072_v9, %v1966_v48  ;;  %v706_v57 = vmul.f32 %v2074_v10, %v1966_v48  ;;  %v2080_v15 = vmul.f32 %v695_v13, %v656_v51  ;;  %v2082_v12 = vmul.f32 %v695_v13, %v665_v41 }
 0x15e   : > { %v690_v49 = vmul.f32 5.0, %v1554_v32 }
 0x15f   : > { %v709_v16 = vmul.f32 0.70710677, %v703_v60  ;;  %v712_v17 = vmul.f32 0.70710677, %v706_v57  ;;  %v721_v23 = vsub.f32 0.0, %v703_v60  ;;  %vm742_vm8 = vcmp.gt.f32.partialorder %v706_v57, 0.0 }
 0x160   : > { %v704_v24 = vmul.f32 %v2080_v15, %v1992_v1  ;;  %v2088_v28 = vmul.f32 %v2082_v12, %v1992_v1  ;;  %v727_v29 = vsub.f32 0.0, %v706_v57  ;;  %v745_v26 = vsel %vm742_vm8, %v706_v57, 1e-10 }
 0x161   : > { %v715_v21 = vadd.f32 %v712_v17, %v709_v16  ;;  %v718_v22 = vsub.f32 %v712_v17, %v709_v16  ;;  %v724_v11 = vsub.f32 %v709_v16, %v712_v17  ;;  %v730_v48 = vsub.f32 0.0, %v709_v16 }
 0x162   : > { %vm754_vm11 = vcmp.gt.f32.partialorder %v703_v60, 0.0  ;;  %vm760_vm12 = vcmp.gt.f32.partialorder %v721_v23, 0.0  ;;  %v710_v14 = vmul.f32 0.70710677, %v704_v24  ;;  %v713_v34 = vmul.f32 0.70710677, %v2088_v28 }
 0x163   : > { %vm736_vm9 = vcmp.gt.f32.partialorder %v715_v21, 0.0  ;;  %vm748_vm10 = vcmp.gt.f32.partialorder %v718_v22, 0.0  ;;  %v757_v1 = vsel %vm754_vm11, %v703_v60, 1e-10  ;;  %vm766_vm13 = vcmp.gt.f32.partialorder %v724_v11, 0.0 }
 0x164   : > { %v739_v25 = vsel %vm736_vm9, %v715_v21, 1e-10  ;;  %v751_v33 = vsel %vm748_vm10, %v718_v22, 1e-10  ;;  %vm772_vm14 = vcmp.gt.f32.partialorder %v727_v29, 0.0  ;;  %v733_v36 = vsub.f32 %v730_v48, %v712_v17 }
 0x165   : > { %v784_v31 = vmax.f32 %v739_v25, %v745_v26  ;;  %v716_v37 = vadd.f32 %v713_v34, %v710_v14  ;;  %v719_v38 = vsub.f32 %v713_v34, %v710_v14  ;;  %vm743_vm15 = vcmp.gt.f32.partialorder %v2088_v28, 0.0 }
 0x166   : > { %v763_v39 = vsel %vm760_vm12, %v721_v23, 1e-10  ;;  %v2095_v41 = vsel %vm766_vm13, %v724_v11, 1e-10  ;;  %v722_v42 = vsub.f32 0.0, %v704_v24  ;;  %vm778_vm4 = vcmp.gt.f32.partialorder %v733_v36, 0.0 }
 0x167   : > { %v787_v35 = vmax.f32 %v784_v31, %v751_v33  ;;  %vm737_vm6 = vcmp.gt.f32.partialorder %v716_v37, 0.0  ;;  %vm749_vm2 = vcmp.gt.f32.partialorder %v719_v38, 0.0  ;;  %v2097_v43 = vsel %vm772_vm14, %v727_v29, 1e-10 }
 0x168   : > { %v740_v54 = vsel %vm737_vm6, %v716_v37, 1e-10  ;;  %v746_v45 = vsel %vm743_vm15, %v2088_v28, 1e-10  ;;  %v725_v59 = vsub.f32 %v710_v14, %v713_v34  ;;  %vm755_vm3 = vcmp.gt.f32.partialorder %v704_v24, 0.0 }
 0x169   : > { %v790_v40 = vmax.f32 %v787_v35, %v757_v1  ;;  %v785_v46 = vmax.f32 %v740_v54, %v746_v45  ;;  %v731_v47 = vsub.f32 0.0, %v710_v14  ;;  %v752_v50 = vsel %vm749_vm2, %v719_v38, 1e-10 }
 0x16a   : > { %v693_v52 = vsel %vm687_vm5, %v690_v49, 1.0  ;;  %v728_v56 = vsub.f32 0.0, %v2088_v28  ;;  %vm761_vm7 = vcmp.gt.f32.partialorder %v722_v42, 0.0  ;;  %v758_v3 = vsel %vm755_vm3, %v704_v24, 1e-10 }
 0x16b   : > { %v793_v44 = vmax.f32 %v790_v40, %v763_v39  ;;  %v788_v58 = vmax.f32 %v785_v46, %v752_v50  ;;  %v2105_v0 = vmul.f32 %v693_v52, %v2054_v61  ;;  %v2109_v53 = vmul.f32 %v693_v52, %v2058_v2 }
 0x16c   : > { %v781_v4 = vsel %vm778_vm4, %v733_v36, 1e-10  ;;  %v734_v7 = vsub.f32 %v731_v47, %v713_v34  ;;  %v2111_v62 = vsel %vm761_vm7, %v722_v42, 1e-10  ;;  %vm767_vm8 = vcmp.gt.f32.partialorder %v725_v59, 0.0 }
 0x16d   : > { %v796_v51 = vmax.f32 %v793_v44, %v2095_v41  ;;  %v791_v5 = vmax.f32 %v788_v58, %v758_v3  ;;  %vm773_vm9 = vcmp.gt.f32.partialorder %v728_v56, 0.0  ;;  %v2116_v61 = vmul.f32 %v2105_v0, %v1979_v55 }
 0x16e   : > { %v2120_v2 = vmul.f32 %v2109_v53, %v1979_v55  ;;  %v2122_v60 = vsel %vm767_vm8, %v725_v59, 1e-10  ;;  %vm779_vm10 = vcmp.gt.f32.partialorder %v734_v7, 0.0  ;;  %v2124_v22 = vsel %vm773_vm9, %v728_v56, 1e-10 }
 0x16f   : > { %v799_v20 = vmax.f32 %v796_v51, %v2097_v43  ;;  %v794_v27 = vmax.f32 %v791_v5, %v2111_v62  ;;  %v2128_v28 = vmul.f32 0.70710677, %v2116_v61  ;;  %v2134_v48 = vsel %vm779_vm10, %v734_v7, 1e-10 }
 0x170   : > { %v2131_v55 = vmul.f32 0.70710677, %v2120_v2  ;;  %vm741_vm12 = vcmp.gt.f32.partialorder %v2120_v2, 0.0  ;;  %v720_v46 = vsub.f32 0.0, %v2116_v61  ;;  %vm753_vm14 = vcmp.gt.f32.partialorder %v2116_v61, 0.0 }
 0x171   : > { %v802_v18 = vmax.f32 %v799_v20, %v781_v4  ;;  %v797_v23 = vmax.f32 %v794_v27, %v2122_v60  ;;  %v2167_v58 = vsel %vm741_vm12, %v2120_v2, 1e-10 }
 0x172   : > { %v717_v42 = vsub.f32 %v2131_v55, %v2128_v28  ;;  %v723_v56 = vsub.f32 %v2128_v28, %v2131_v55  ;;  %vm759_vm15 = vcmp.gt.f32.partialorder %v720_v46, 0.0 }
 0x173   : > { %v805_v8 = vsub.f32 %v739_v25, %v802_v18  ;;  %v814_v63 = vsub.f32 %v745_v26, %v802_v18  ;;  %v823_v6 = vsub.f32 %v751_v33, %v802_v18  ;;  %v832_v13 = vsub.f32 %v757_v1, %v802_v18 }
 0x174   : > { %v841_v21 = vsub.f32 1e-10, %v802_v18  ;;  %v850_v24 = vsub.f32 %v763_v39, %v802_v18  ;;  %v800_v29 = vmax.f32 %v797_v23, %v2124_v22  ;;  %v859_v26 = vsub.f32 %v2095_v41, %v802_v18 }
 0x175   : > { %v809_v57 = vmul.f32 1.442695, %v805_v8  ;;  %v818_v16 = vmul.f32 1.442695, %v814_v63  ;;  %v827_v17 = vmul.f32 1.442695, %v823_v6  ;;  %v868_v32 = vsub.f32 %v2097_v43, %v802_v18 }
 0x176   : > { %v836_v11 = vmul.f32 1.442695, %v832_v13  ;;  %v845_v25 = vmul.f32 1.442695, %v841_v21  ;;  %v2138_v30 = vmax.f32 %v800_v29, %v2134_v48  ;;  %v854_v31 = vmul.f32 1.442695, %v850_v24 }
 0x177   : > { %1555 = vpow2.f32 %v809_v57  ;;  %v714_v33 = vadd.f32 %v2131_v55, %v2128_v28  ;;  %v877_v35 = vsub.f32 %v781_v4, %v802_v18  ;;  %v863_v37 = vmul.f32 1.442695, %v859_v26 }
 0x178   : > { %1557 = vpow2.f32 %v818_v16  ;;  %v806_v14 = vsub.f32 %v740_v54, %v2138_v30  ;;  %v815_v34 = vsub.f32 %v746_v45, %v2138_v30  ;;  %v824_v1 = vsub.f32 %v752_v50, %v2138_v30 }
 0x179   : > { %1559 = vpow2.f32 %v827_v17  ;;  %v833_v36 = vsub.f32 %v758_v3, %v2138_v30  ;;  %v842_v49 = vsub.f32 1e-10, %v2138_v30  ;;  %v872_v41 = vmul.f32 1.442695, %v868_v32 }
 0x17a   : > { %1561 = vpow2.f32 %v836_v11  ;;  %v811_v38 = vmul.f32 1.442695, %v806_v14  ;;  %v820_v39 = vmul.f32 1.442695, %v815_v34  ;;  %v829_v40 = vmul.f32 1.442695, %v824_v1 }
 0x17b   : > { %1563 = vpow2.f32 %v845_v25  ;;  %vm735_vm11 = vcmp.gt.f32.partialorder %v714_v33, 0.0  ;;  %v838_v44 = vmul.f32 1.442695, %v833_v36  ;;  %v851_v54 = vsub.f32 %v2111_v62, %v2138_v30 }
 0x17c   : > { %1565 = vpow2.f32 %v854_v31  ;;  %v881_v59 = vmul.f32 1.442695, %v877_v35  ;;  %v847_v47 = vmul.f32 1.442695, %v842_v49  ;;  %v2160_v50 = vsel %vm735_vm11, %v714_v33, 1e-10 }
 0x17d   : > { %1567 = vpow2.f32 %v811_v38  ;;  %vm747_vm13 = vcmp.gt.f32.partialorder %v717_v42, 0.0  ;;  %v856_v3 = vmul.f32 1.442695, %v851_v54  ;;  %v860_v4 = vsub.f32 %v2122_v60, %v2138_v30 }
 0x17e   : > { %1569 = vpow2.f32 %v820_v39  ;;  %v729_v18 = vsub.f32 0.0, %v2128_v28  ;;  %v783_v7 = vmax.f32 %v2160_v50, %v2167_v58  ;;  %v869_v27 = vsub.f32 %v2124_v22, %v2138_v30 }
 0x17f   : > { %1571 = vpow2.f32 %v863_v37  ;;  %v750_v8 = vsel %vm747_vm13, %v717_v42, 1e-10  ;;  %v726_v6 = vsub.f32 0.0, %v2120_v2  ;;  %v865_v16 = vmul.f32 1.442695, %v860_v4 }
 0x180   : > { %1573 = vpow2.f32 %v829_v40  ;;  %v786_v13 = vmax.f32 %v783_v7, %v750_v8  ;;  %v756_v17 = vsel %vm753_vm14, %v2116_v61, 1e-10  ;;  %v878_v22 = vsub.f32 %v2134_v48, %v2138_v30 }
 0x181   : > { %v2150_v43 = vpop.eup %1555  ;;  %1575 = vpow2.f32 %v872_v41  ;;  %v732_v23 = vsub.f32 %v729_v18, %v2131_v55  ;;  %vm765_vm5 = vcmp.gt.f32.partialorder %v723_v56, 0.0  ;;  %v874_v11 = vmul.f32 1.442695, %v869_v27 }
 0x182   : > { %v2155_v45 = vpop.eup %1557  ;;  %1577 = vpow2.f32 %v838_v44  ;;  %v789_v24 = vmax.f32 %v786_v13, %v756_v17  ;;  %v762_v29 = vsel %vm759_vm15, %v720_v46, 1e-10  ;;  %vm771_vm6 = vcmp.gt.f32.partialorder %v726_v6, 0.0 }
 0x183   : > { %v886_v51 = vadd.f32 %v2155_v45, %v2150_v43  ;;  %v2162_v52 = vpop.eup %1559  ;;  %1579 = vpow2.f32 %v881_v59  ;;  %v768_v55 = vsel %vm765_vm5, %v723_v56, 1e-10  ;;  %v883_v32 = vmul.f32 1.442695, %v878_v22 }
 0x184   : > { %v2172_v5 = vpop.eup %1561  ;;  %1581 = vpow2.f32 %v847_v47  ;;  %v792_v26 = vmax.f32 %v789_v24, %v762_v29  ;;  %vm777_vm2 = vcmp.gt.f32.partialorder %v732_v23, 0.0  ;;  %v774_v35 = vsel %vm771_vm6, %v726_v6, 1e-10 }
 0x185   : > { %v889_v20 = vadd.f32 %v2162_v52, %v886_v51  ;;  %v2181_v63 = vpop.eup %1563  ;;  %1583 = vpow2.f32 %v856_v3  ;;  %v780_v49 = vsel %vm777_vm2, %v732_v23, 1e-10 }
 0x186   : > { %v2184_v60 = vpop.eup %1565  ;;  %1585 = vpow2.f32 %v865_v16  ;;  %v795_v14 = vmax.f32 %v792_v26, %v768_v55 }
 0x187   : > { %v892_v62 = vadd.f32 %v2172_v5, %v889_v20  ;;  %v2188_v21 = vpop.eup %1567  ;;  %1587 = vpow2.f32 %v874_v11 }
 0x188   : > { %v2193_v2 = vpop.eup %1569  ;;  %v798_v38 = vmax.f32 %v795_v14, %v774_v35  ;;  %1589 = vpow2.f32 %v883_v32 }
 0x189   : > { %v895_v57 = vadd.f32 %v2181_v63, %v892_v62  ;;  %v2196_v25 = vpop.eup %1571  ;;  %v887_v61 = vadd.f32 %v2193_v2, %v2188_v21 }
 0x18a   : > { %v2200_v31 = vpop.eup %1573  ;;  %v801_v42 = vmax.f32 %v798_v38, %v780_v49 }
 0x18b   : > { %v898_v28 = vadd.f32 %v2184_v60, %v895_v57  ;;  %v2203_v30 = vpop.eup %1575  ;;  %v890_v33 = vadd.f32 %v2200_v31, %v887_v61 }
 0x18c   : > { %v1578_v34 = vpop.eup %1577  ;;  %v804_v59 = vsub.f32 %v2160_v50, %v801_v42  ;;  %v813_v46 = vsub.f32 %v2167_v58, %v801_v42  ;;  %v822_v51 = vsub.f32 %v750_v8, %v801_v42  ;;  %v831_v47 = vsub.f32 %v756_v17, %v801_v42 }
 0x18d   : > { %v901_v48 = vadd.f32 %v2196_v25, %v898_v28  ;;  %v2207_v36 = vpop.eup %1579  ;;  %v893_v37 = vadd.f32 %v1578_v34, %v890_v33  ;;  %v840_v56 = vsub.f32 1e-10, %v801_v42  ;;  %v849_v4 = vsub.f32 %v762_v29, %v801_v42 }
 0x18e   : > { %v1582_v39 = vpop.eup %1581  ;;  %v807_v20 = vmul.f32 1.442695, %v804_v59  ;;  %v816_v3 = vmul.f32 1.442695, %v813_v46  ;;  %v825_v7 = vmul.f32 1.442695, %v822_v51  ;;  %v858_v62 = vsub.f32 %v768_v55, %v801_v42 }
 0x18f   : > { %v904_v1 = vadd.f32 %v2203_v30, %v901_v48  ;;  %v896_v41 = vadd.f32 %v1582_v39, %v893_v37  ;;  %v1584_v44 = vpop.eup %1583  ;;  %v834_v27 = vmul.f32 1.442695, %v831_v47  ;;  %v867_v6 = vsub.f32 %v774_v35, %v801_v42 }
 0x190   : > { %v1586_v18 = vpop.eup %1585  ;;  %v843_v16 = vmul.f32 1.442695, %v840_v56  ;;  %v852_v22 = vmul.f32 1.442695, %v849_v4  ;;  %v861_v58 = vmul.f32 1.442695, %v858_v62  ;;  %v876_v24 = vsub.f32 %v780_v49, %v801_v42 }
 0x191   : > { %v907_v40 = vadd.f32 %v2207_v36, %v904_v1  ;;  %v899_v54 = vadd.f32 %v1584_v44, %v896_v41  ;;  %v1588_v57 = vpop.eup %1587  ;;  %v870_v17 = vmul.f32 1.442695, %v867_v6 }
 0x192   : > { %v1590_v8 = vpop.eup %1589  ;;  %v879_v48 = vmul.f32 1.442695, %v876_v24 }
 0x193   : > { %1591 = vrcp.f32 %v907_v40  ;;  %v902_v13 = vadd.f32 %v1586_v18, %v899_v54 }
 0x194   : > { %1593 = vpow2.f32 %v807_v20 }
 0x195   : > { %1595 = vpow2.f32 %v816_v3  ;;  %v905_v50 = vadd.f32 %v1588_v57, %v902_v13  ;;  %v1615_v57 = vld [vmem:[%s1883_s14 + $0x10] sm:$0xff] }
 0x196   : > { %1597 = vpow2.f32 %v825_v7 }
 0x197   : > { %1599 = vpow2.f32 %v834_v27  ;;  %v908_v28 = vadd.f32 %v1590_v8, %v905_v50 }
 0x198   : > { %1601 = vpow2.f32 %v843_v16 }
 0x199   : > { %1603 = vpow2.f32 %v852_v22 }
 0x19a   : > { %1605 = vpow2.f32 %v861_v58 }
 0x19b   : > { %1607 = vpow2.f32 %v870_v17 }
 0x19c   : > { %1609 = vrcp.f32 %v908_v28 }
 0x19d   : > { %v1592_v23 = vpop.eup %1591  ;;  %1611 = vpow2.f32 %v879_v48 }
 0x19e   : > { %v916_v11 = vmul.f32 %v1592_v23, %v2072_v9  ;;  %v919_v29 = vmul.f32 %v1592_v23, %v2074_v10  ;;  %v2215_v61 = vmul.f32 %v1592_v23, %v1889_v19  ;;  %v1594_v32 = vpop.eup %1593 }
 0x19f   : > { %v1596_v14 = vpop.eup %1595 }
 0x1a0   : > { %v921_v26 = vmul.f32 %v2150_v43, %v2215_v61  ;;  %v969_v55 = vmul.f32 %v2162_v52, %v2215_v61  ;;  %v2223_v9 = vmul.f32 %v2150_v43, %v916_v11  ;;  %v2226_v10 = vmul.f32 %v2150_v43, %v919_v29  ;;  %v1598_v40 = vpop.eup %1597 }
 0x1a1   : > { %v2229_v19 = vmul.f32 %v2162_v52, %v916_v11  ;;  %v2232_v33 = vmul.f32 %v2162_v52, %v919_v29  ;;  %v2235_v34 = vmul.f32 %v2172_v5, %v916_v11  ;;  %v2238_v1 = vmul.f32 %v2184_v60, %v916_v11  ;;  %v1600_v54 = vpop.eup %1599 }
 0x1a2   : > { %925 = vrot.lane.b32.xlu0 %v921_v26, %s1743_s16  ;;  %v2242_v35 = vmul.f32 %v2155_v45, %v2215_v61  ;;  %v2246_v43 = vmul.f32 %v2203_v30, %v2215_v61  ;;  %v885_v37 = vadd.f32 %v1596_v14, %v1594_v32  ;;  %v2250_v52 = vmul.f32 %v2181_v63, %v2215_v61  ;;  %v1602_v56 = vpop.eup %1601 }
 0x1a3   : > { %v2253_v38 = vmul.f32 %v2196_v25, %v916_v11  ;;  %v2256_v39 = vmul.f32 %v2196_v25, %v919_v29  ;;  %v2259_v49 = vmul.f32 %v2172_v5, %v919_v29  ;;  %v2262_v41 = vmul.f32 %v2207_v36, %v916_v11  ;;  %v1604_v18 = vpop.eup %1603 }
 0x1a4   : > { %v2265_v42 = vmul.f32 %v2207_v36, %v919_v29  ;;  %v2268_v44 = vmul.f32 %v2184_v60, %v919_v29  ;;  %v888_v59 = vadd.f32 %v1598_v40, %v885_v37  ;;  %v2272_v46 = vmul.f32 %v2155_v45, %v916_v11  ;;  %v1606_v62 = vpop.eup %1605 }
 0x1a5   : > { %v2275_v51 = vmul.f32 %v2155_v45, %v919_v29  ;;  %v2278_v47 = vmul.f32 %v2181_v63, %v916_v11  ;;  %v2281_v20 = vmul.f32 %v2203_v30, %v916_v11  ;;  %v2284_v3 = vmul.f32 %v2203_v30, %v919_v29  ;;  %v1608_v27 = vpop.eup %1607 }
 0x1a6   : > { %973 = vrot.lane.b32.xlu0 %v969_v55, %s1742_s15  ;;  %v2287_v4 = vmul.f32 %v2181_v63, %v919_v29  ;;  %v891_v7 = vadd.f32 %v1600_v54, %v888_v59  ;;  %v1610_v6 = vpop.eup %1609  ;;  %v1072_v26 = vmul.f32 %v2196_v25, %v2215_v61  ;;  %v1616_v55 = vld [vmem:[%s1883_s14] sm:$0xff] }
 0x1a7   : > { %v914_v16 = vmul.f32 %v1615_v57, %v1610_v6  ;;  %v917_v22 = vmul.f32 %v1610_v6, %v2080_v15  ;;  %v920_v50 = vmul.f32 %v1610_v6, %v2082_v12  ;;  %v1612_v11 = vpop.eup %1611 }
 0x1a8   : > { %v894_v45 = vadd.f32 %v1602_v56, %v891_v7 }
 0x1a9   : > { %v922_v58 = vmul.f32 %v2188_v21, %v914_v16  ;;  %v958_v8 = vmul.f32 %v2193_v2, %v914_v16  ;;  %v2295_v63 = vmul.f32 %v2188_v21, %v917_v22  ;;  %v2298_v17 = vmul.f32 %v2188_v21, %v920_v50 }
 0x1aa   : > { %v897_v13 = vadd.f32 %v1604_v18, %v894_v45  ;;  %v2301_v23 = vmul.f32 %v2200_v31, %v917_v22  ;;  %v2304_v24 = vmul.f32 %v2200_v31, %v920_v50  ;;  %v2308_v12 = vmul.f32 %v2193_v2, %v917_v22  ;;  %v1617_v45 = vld [vmem:[%s1883_s14 + $0x8] sm:$0xff] }
 0x1ab   : > { %927 = vrot.lane.b32.xlu1 %v922_v58, %s1743_s16  ;;  %v2311_v28 = vmul.f32 %v2193_v2, %v920_v50  ;;  %v970_v29 = vmul.f32 %v2200_v31, %v914_v16 }
 0x1ac   : > { %v900_v30 = vadd.f32 %v1606_v62, %v897_v13 }
 0x1ae   : > { %v903_v15 = vadd.f32 %v1608_v27, %v900_v30 }
 0x1af   : > { %975 = vrot.lane.b32.xlu1 %v970_v29, %s1742_s15 }
 0x1b0   : > { %v906_v21 = vadd.f32 %v1612_v11, %v903_v15 }
 0x1b2   : > { %1613 = vrcp.f32 %v906_v21 }
 0x1b3   : > { %1077 = vrot.lane.b32.xlu1 %v1072_v26, %s1743_s16 }
 0x1bc   : > { %v1614_v48 = vpop.eup %1613 }
 0x1bd   : > { %v912_v32 = vmul.f32 %v1616_v55, %v1614_v48  ;;  %v915_v14 = vmul.f32 %v1614_v48, %v2105_v0  ;;  %v918_v2 = vmul.f32 %v1614_v48, %v2109_v53  ;;  %v1026_v0 = vmul.f32 %v2172_v5, %v2215_v61 }
 0x1be   : > { %v1050_v53 = vmul.f32 %v2184_v60, %v2215_v61 }
 0x1bf   : > { %v1071_v37 = vmul.f32 %v1606_v62, %v912_v32  ;;  %v1119_v40 = vmul.f32 %v1612_v11, %v912_v32  ;;  %v1083_v31 = vmul.f32 %v1606_v62, %v915_v14  ;;  %v1095_v54 = vmul.f32 %v1606_v62, %v918_v2 }
 0x1c0   : > { %v1131_v59 = vmul.f32 %v1612_v11, %v915_v14  ;;  %v1143_v56 = vmul.f32 %v1612_v11, %v918_v2  ;;  %v1107_v18 = vmul.f32 %v1608_v27, %v912_v32  ;;  %v2321_v7 = vmul.f32 %v1608_v27, %v915_v14 }
 0x1c1   : > { %1075 = vrot.lane.b32.xlu0 %v1071_v37, %s1743_s16  ;;  %1123 = vrot.lane.b32.xlu1 %v1119_v40, %s1742_s15  ;;  %v2325_v25 = vmul.f32 %v1608_v27, %v918_v2  ;;  %v1120_v62 = vmul.f32 %v2207_v36, %v2215_v61 }
 0x1c5   : > { %1028 = vrot.lane.b32.xlu0 %v1026_v0, %s1743_s16  ;;  %1052 = vrot.lane.b32.xlu1 %v1050_v53, %s1742_s15 }
 0x1c9   : > { %1125 = vrot.lane.b32.xlu0 %v1120_v62, %s1742_s15 }
 0x1e8   : > { %1180 = vadd.xlane.f32.xlu0 %v1617_v45 }
 0x1fe   : > { %937 = vrot.lane.b32.xlu0 %v2223_v9, %s1743_s16 }
 0x202   : > { %949 = vrot.lane.b32.xlu0 %v2226_v10, %s1743_s16 }
 0x206   : > { %985 = vrot.lane.b32.xlu0 %v2229_v19, %s1742_s15 }
 0x20a   : > { %997 = vrot.lane.b32.xlu0 %v2232_v33, %s1742_s15 }
 0x20e   : > { %1087 = vrot.lane.b32.xlu0 %v1083_v31, %s1743_s16 }
 0x212   : > { %1099 = vrot.lane.b32.xlu0 %v1095_v54, %s1743_s16 }
 0x214   : > { %v926_v5 = vpop.permute.xlu0 %925 }
 0x215   : > { %v959_v36 = vadd.f32 %v2242_v35, %v926_v5 }
 0x216   : > { %1034 = vrot.lane.b32.xlu0 %v2235_v34, %s1743_s16 }
 0x218   : > { %v974_v60 = vpop.permute.xlu0 %973 }
 0x219   : > { %v979_v9 = vadd.f32 %v974_v60, %v959_v36 }
 0x21a   : > { %1135 = vrot.lane.b32.xlu0 %v1131_v59, %s1742_s15 }
 0x21b   : > { %v1007_v33 = vrot.slane %v979_v9, 1 }
 0x21d   : > { %v928_v61 = vpop.permute.xlu1 %927 }
 0x21e   : > { %1147 = vrot.lane.b32.xlu0 %v1143_v56, %s1742_s15  ;;  %v960_v10 = vadd.f32 %v958_v8, %v928_v61 }
 0x221   : > { %v976_v19 = vpop.permute.xlu1 %975 }
 0x222   : > { %1058 = vrot.lane.b32.xlu0 %v2238_v1, %s1742_s15  ;;  %v980_v27 = vadd.f32 %v976_v19, %v960_v10 }
 0x224   : > { %v1008_v34 = vrot.slane %v980_v27, 1 }
 0x225   : > { %v1078_v13 = vpop.permute.xlu1 %1077 }
 0x226   : > { %v1009_v6 = vsel %vm407_vm1, %v1007_v33, %v1008_v34  ;;  %v1110_v1 = vadd.f32 %v2246_v43, %v1078_v13 }
 0x233   : > { %v1076_v57 = vpop.permute.xlu0 %1075  ;;  %v1124_v16 = vpop.permute.xlu1 %1123 }
 0x234   : > { %v1109_v35 = vadd.f32 %v1107_v18, %v1076_v57 }
 0x236   : > { %v1129_v30 = vadd.f32 %v1124_v16, %v1109_v35 }
 0x237   : > { %v1029_v22 = vpop.permute.xlu0 %1028  ;;  %v1053_v50 = vpop.permute.xlu1 %1052 }
 0x238   : > { %v1045_v58 = vadd.f32 %v2250_v52, %v1029_v22  ;;  %v1157_v21 = vrot.slane %v1129_v30, 7 }
 0x23a   : > { %v1055_v8 = vadd.f32 %v1053_v50, %v1045_v58 }
 0x23b   : > { %v1126_v15 = vpop.permute.xlu0 %1125 }
 0x23c   : > { %v1130_v11 = vadd.f32 %v1126_v15, %v1110_v1  ;;  %v1068_v29 = vadd.f32 %v1055_v8, %v1009_v6 }
 0x23e   : > { %v1158_v26 = vrot.slane %v1130_v11, 7 }
 0x240   : > { %v1159_v52 = vsel %vm395_vm0, %v1157_v21, %v1158_v26 }
 0x241   : > { %v1161_v48 = vadd.f32 %v1159_v52, %v1068_v29 }
 0x243   : > { %1189 = vadd.xlane.f32.xlu1 %v1161_v48  ;;  %1176 = vst [vmem:[%s359_s10] sm:$0xff] %v1161_v48 }
 0x254   : > { %939 = vrot.lane.b32.xlu1 %v2295_v63, %s1743_s16 }
 0x258   : > { %951 = vrot.lane.b32.xlu1 %v2298_v17, %s1743_s16 }
 0x25c   : > { %987 = vrot.lane.b32.xlu1 %v2301_v23, %s1742_s15 }
 0x260   : > { %999 = vrot.lane.b32.xlu1 %v2304_v24, %s1742_s15 }
 0x264   : > { %1089 = vrot.lane.b32.xlu1 %v2253_v38, %s1743_s16 }
 0x268   : > { %1101 = vrot.lane.b32.xlu1 %v2256_v39, %s1743_s16 }
 0x26c   : > { %1040 = vrot.lane.b32.xlu1 %v2259_v49, %s1743_s16  ;;  %s2395_s16 = scalar_lea.hbm %s2529_s2, %s2389_s11 }
 0x270   : > { %1137 = vrot.lane.b32.xlu1 %v2262_v41, %s1742_s15 }
 0x274   : > { %1149 = vrot.lane.b32.xlu1 %v2265_v42, %s1742_s15 }
 0x275   : > { %v1181_v43 = vpop.xlane.xlu0 %1180 }
 0x276   : > { %v1182_v63 = vrot.slane %v1181_v43, 4 }
 0x278   : > { %v1183_v17 = vadd.f32 %v1182_v63, %v1181_v43  ;;  %1064 = vrot.lane.b32.xlu1 %v2268_v44, %s1742_s15  ;;  %s1744_s15 = smov [#allocation3]  }
 0x279   : > { %s1622_s10 = sshll.u32 %s1744_s15, 4  ;;  %s1623_s10 = int_to_ptr.vmem [resolvable:$false] %s1622_s10 }
 0x27a   : > { %v1184_v38 = vrot.slane %v1183_v17, 2  ;;  %s1624_s23 = scalar_lea.vmem %s1623_s10, 256  ;;  %p1625_p3 = scmp.lt.s32.totalorder %s1241_s17, %s1623_s10 }
 0x27b   : > { %p1626_p4 = scmp.lt.s32.totalorder %s1624_s23, %s1618_s9 }
 0x27c   : > { %v1185_v23 = vadd.f32 %v1184_v38, %v1183_v17 }
 0x27d   : > { %p1627_p5 = por %p1626_p4, %p1625_p3 }
 0x27e   : > { %v1186_v39 = vrot.slane %v1185_v23, 1 }
 0x27f   : > { %p1628_p7 = pnand %p1627_p5, %p1621_p2 }
 0x280   : > { %v1187_v24 = vadd.f32 %v1186_v39, %v1185_v23 }
 0x282   : > { %1485 = vpush %v1187_v24 }
 0x283   : > { %1631 = shalt.err (!%p1628_p7)
}
 0x284   : > { %s1632_s25 = scalar_lea.hbm %s2395_s16, 128  ;;  %s1636_s15 = scalar_lea.hbm %s2529_s2, 256 }
 0x285   : > { %p1633_p10 = scmp.ne.s32.totalorder %s2395_s16, %s1632_s25  ;;  %p1637_p13 = scmp.lt.u32.totalorder %s2395_s16, %s2529_s2 }
 0x286   : > { %p1638_p0 = scmp.lt.u32.totalorder %s1636_s15, %s1632_s25  ;;  %p1640_p2 = scmp.lt.u32.totalorder %s1632_s25, %s2395_s16 }
 0x287   : > { %p1634_p11 = pnand %p1633_p10, %p1819_p6 }
 0x288   : > { %p1639_p1 = por %p1638_p0, %p1637_p13 }
 0x289   : > { %p1635_p12 = pneg %p1634_p11 }
 0x28a   : > { %p1641_p3 = por %p1640_p2, %p1639_p1 }
 0x28c   : > { %p1642_p4 = pnand %p1641_p3, %p1635_p12 }
 0x28e   : > { %1645 = shalt.err (!%p1642_p4)
}
 0x28f   : > { %1489 = dma.vmem_to_hbm [thread:$0]  (%p1819_p6), %s1241_s17, 128, %s2395_s16, %s1210_s8   ;;  %v938_v49 = vpop.permute.xlu0 %937 }
 0x290   : > { %v963_v53 = vadd.f32 %v2272_v46, %v938_v49  ;;  %s342_s23 = scalar_lea.vmem [#allocation5], %s1453_s26  ;;  %s1214_s16 = sand.u32 1, %s1801_s22  }
 0x291   : > { %s1252_s7 = sshll.u32 %s342_s23, 4  ;;  %s1267_s17 = sshll.u32 %s2033_s30, 4  ;;  %s2434_s7 = int_to_ptr.vmem [resolvable:$true] %s1252_s7  ;;  %s2442_s17 = int_to_ptr.vmem [resolvable:$true] %s1267_s17 }
 0x292   : > { %s2440_s12 = scalar_lea.hbm %s2530_s3, %s2389_s11  ;;  %s2448_s25 = scalar_lea.hbm %s2531_s4, %s2389_s11 }
 0x293   : > { %v950_v41 = vpop.permute.xlu0 %949  ;;  %s2450_s30 = scalar_lea.sflag [#allocation6], %s1214_s16  ;;  %s1646_s13 = scalar_lea.vmem %s2434_s7, 256 }
 0x294   : > { %v967_v61 = vadd.f32 %v2275_v51, %v950_v41  ;;  %p1647_p5 = scmp.ne.s32.totalorder %s2434_s7, %s1646_s13  ;;  %s1745_s14 = smov [#allocation5]  }
 0x295   : > { %s1650_s15 = sshll.u32 %s1745_s14, 4  ;;  %s1651_s15 = int_to_ptr.vmem [resolvable:$false] %s1650_s15 }
 0x296   : > { %p1648_p7 = pnand %p1647_p5, %p1819_p6  ;;  %s1652_s10 = scalar_lea.vmem %s1651_s15, 512 }
 0x297   : > { %v986_v42 = vpop.permute.xlu0 %985  ;;  %p1653_p11 = scmp.lt.s32.totalorder %s2434_s7, %s1651_s15  ;;  %p1654_p12 = scmp.lt.s32.totalorder %s1652_s10, %s1646_s13 }
 0x298   : > { %v991_v45 = vadd.f32 %v986_v42, %v963_v53  ;;  %p1649_p10 = pneg %p1648_p7 }
 0x299   : > { %p1655_p13 = por %p1654_p12, %p1653_p11 }
 0x29a   : > { %v1014_v33 = vrot.slane %v991_v45, 1 }
 0x29b   : > { %v998_v44 = vpop.permute.xlu0 %997  ;;  %p1656_p0 = pnand %p1655_p13, %p1649_p10 }
 0x29c   : > { %v1003_v27 = vadd.f32 %v998_v44, %v967_v61 }
 0x29e   : > { %v1021_v22 = vrot.slane %v1003_v27, 1 }
 0x29f   : > { %v1088_v55 = vpop.permute.xlu0 %1087 }
 0x2a3   : > { %v1100_v32 = vpop.permute.xlu0 %1099 }
 0x2a4   : > { %v1117_v15 = vadd.f32 %v2325_v25, %v1100_v32 }
 0x2a7   : > { %v1035_v14 = vpop.permute.xlu0 %1034 }
 0x2a8   : > { %v1047_v19 = vadd.f32 %v2278_v47, %v1035_v14  ;;  %v1113_v47 = vadd.f32 %v2321_v7, %v1088_v55 }
 0x2ab   : > { %v1136_v37 = vpop.permute.xlu0 %1135 }
 0x2ac   : > { %v1141_v30 = vadd.f32 %v1136_v37, %v1113_v47 }
 0x2ae   : > { %v1164_v29 = vrot.slane %v1141_v30, 7 }
 0x2af   : > { %v1148_v56 = vpop.permute.xlu0 %1147 }
 0x2b0   : > { %v1153_v21 = vadd.f32 %v1148_v56, %v1117_v15 }
 0x2b2   : > { %v1171_v17 = vrot.slane %v1153_v21, 7 }
 0x2b3   : > { %v1059_v9 = vpop.permute.xlu0 %1058 }
 0x2b4   : > { %v1061_v13 = vadd.f32 %v1059_v9, %v1047_v19 }
 0x2d0   : > { %v1190_v2 = vpop.xlane.xlu1 %1189 }
 0x2d1   : > { %v1191_v40 = vrot.slane %v1190_v2, 4 }
 0x2d3   : > { %v1192_v31 = vadd.f32 %v1191_v40, %v1190_v2 }
 0x2d4   : > { %v940_v54 = vpop.permute.xlu1 %939 }
 0x2d5   : > { %v1193_v59 = vrot.slane %v1192_v31, 2  ;;  %v964_v5 = vadd.f32 %v2308_v12, %v940_v54 }
 0x2d7   : > { %v1194_v18 = vadd.f32 %v1193_v59, %v1192_v31 }
 0x2d8   : > { %v952_v0 = vpop.permute.xlu1 %951 }
 0x2d9   : > { %v1195_v62 = vrot.slane %v1194_v18, 1  ;;  %v968_v34 = vadd.f32 %v2311_v28, %v952_v0 }
 0x2db   : > { %v1196_v60 = vadd.f32 %v1195_v62, %v1194_v18 }
 0x2dc   : > { %v988_v36 = vpop.permute.xlu1 %987 }
 0x2dd   : > { %v992_v10 = vadd.f32 %v988_v36, %v964_v5  ;;  %1487 = vpush %v1196_v60 }
 0x2df   : > { %v1015_v6 = vrot.slane %v992_v10, 1 }
 0x2e0   : > { %v1000_v46 = vpop.permute.xlu1 %999 }
 0x2e1   : > { %v1016_v57 = vsel %vm407_vm1, %v1014_v33, %v1015_v6  ;;  %v1004_v16 = vadd.f32 %v1000_v46, %v968_v34 }
 0x2e2   : > { %v1069_v12 = vadd.f32 %v1061_v13, %v1016_v57 }
 0x2e3   : > { %v1022_v50 = vrot.slane %v1004_v16, 1 }
 0x2e4   : > { %v1090_v35 = vpop.permute.xlu1 %1089 }
 0x2e5   : > { %v1023_v51 = vsel %vm407_vm1, %v1021_v22, %v1022_v50  ;;  %v1114_v28 = vadd.f32 %v2281_v20, %v1090_v35 }
 0x2e8   : > { %v1102_v58 = vpop.permute.xlu1 %1101 }
 0x2e9   : > { %v1118_v26 = vadd.f32 %v2284_v3, %v1102_v58 }
 0x2ec   : > { %v1041_v1 = vpop.permute.xlu1 %1040 }
 0x2ed   : > { %v1049_v20 = vadd.f32 %v2287_v4, %v1041_v1 }
 0x2f0   : > { %v1138_v8 = vpop.permute.xlu1 %1137 }
 0x2f1   : > { %v1142_v11 = vadd.f32 %v1138_v8, %v1114_v28 }
 0x2f3   : > { %v1165_v52 = vrot.slane %v1142_v11, 7 }
 0x2f4   : > { %v1150_v48 = vpop.permute.xlu1 %1149 }
 0x2f5   : > { %v1166_v43 = vsel %vm395_vm0, %v1164_v29, %v1165_v52  ;;  %v1154_v7 = vadd.f32 %v1150_v48, %v1118_v26 }
 0x2f6   : > { %v1168_v63 = vadd.f32 %v1166_v43, %v1069_v12 }
 0x2f7   : > { %v1172_v38 = vrot.slane %v1154_v7, 7 }
 0x2f8   : > { %1177 = vst [vmem:[%s342_s23] sm:$0xff] %v1168_v63  ;;  %v1065_v25 = vpop.permute.xlu1 %1064 }
 0x2f9   : > { %v1067_v3 = vadd.f32 %v1065_v25, %v1049_v20  ;;  %v1173_v23 = vsel %vm395_vm0, %v1171_v17, %v1172_v38 }
 0x2fb   : > { %v1070_v39 = vadd.f32 %v1067_v3, %v1023_v51 }
 0x2fd   : > { %v1175_v4 = vadd.f32 %v1173_v23, %v1070_v39 }
 0x2ff   : > { %1473 = vst [vmem:[%s342_s23 + $0x8] sm:$0xff] %v1175_v4 }
 0x300   : > { %1659 = shalt.err (!%p1656_p0)
}
 0x301   : > { %s1660_s11 = scalar_lea.hbm %s2440_s12, 256  ;;  %s1664_s8 = scalar_lea.hbm %s2530_s3, 512 }
 0x302   : > { %p1661_p1 = scmp.ne.s32.totalorder %s2440_s12, %s1660_s11  ;;  %p1665_p4 = scmp.lt.u32.totalorder %s2440_s12, %s2530_s3 }
 0x303   : > { %p1666_p5 = scmp.lt.u32.totalorder %s1664_s8, %s1660_s11  ;;  %p1668_p10 = scmp.lt.u32.totalorder %s1660_s11, %s2440_s12 }
 0x304   : > { %p1662_p2 = pnand %p1661_p1, %p1819_p6 }
 0x305   : > { %p1667_p7 = por %p1666_p5, %p1665_p4 }
 0x306   : > { %p1663_p3 = pneg %p1662_p2 }
 0x307   : > { %p1669_p11 = por %p1668_p10, %p1667_p7 }
 0x309   : > { %p1670_p12 = pnand %p1669_p11, %p1663_p3 }
 0x30b   : > { %1673 = shalt.err (!%p1670_p12)
}
 0x30c   : > { %s1746_s22 = smov 128   ;;  %s1747_s13 = smov 256  }
 0x30d   : > { %s1748_s14 = smov 8   ;;  %s1674_s15 = scalar_lea.vmem %s2442_s17, 256 }
 0x30e   : > { %1490 = dma.vmem_to_hbm [thread:$0]  (%p1819_p6), %s2434_s7, 256, %s2440_s12, %s2450_s30, %s1746_s22, %s1747_s13, %s1748_s14  }
 0x30f   : > { %p1675_p13 = scmp.ne.s32.totalorder %s2442_s17, %s1674_s15  ;;  %s1749_s10 = smov [#allocation7]  }
 0x310   : > { %s1678_s11 = sshll.u32 %s1749_s10, 4  ;;  %s1679_s11 = int_to_ptr.vmem [resolvable:$false] %s1678_s11 }
 0x311   : > { %p1676_p0 = pnand %p1675_p13, %p1819_p6  ;;  %s1680_s23 = scalar_lea.vmem %s1679_s11, 512 }
 0x312   : > { %p1681_p2 = scmp.lt.s32.totalorder %s2442_s17, %s1679_s11  ;;  %p1682_p3 = scmp.lt.s32.totalorder %s1680_s23, %s1674_s15 }
 0x313   : > { %p1677_p1 = pneg %p1676_p0 }
 0x314   : > { %p1683_p4 = por %p1682_p3, %p1681_p2 }
 0x316   : > { %p1684_p5 = pnand %p1683_p4, %p1677_p1 }
 0x318   : > { %1687 = shalt.err (!%p1684_p5)
}
 0x319   : > { %s1688_s7 = scalar_lea.hbm %s2448_s25, 256  ;;  %s1692_s8 = scalar_lea.hbm %s2531_s4, 512 }
 0x31a   : > { %p1689_p7 = scmp.ne.s32.totalorder %s2448_s25, %s1688_s7  ;;  %p1693_p12 = scmp.lt.u32.totalorder %s2448_s25, %s2531_s4 }
 0x31b   : > { %p1694_p13 = scmp.lt.u32.totalorder %s1692_s8, %s1688_s7  ;;  %p1696_p1 = scmp.lt.u32.totalorder %s1688_s7, %s2448_s25 }
 0x31c   : > { %p1690_p10 = pnand %p1689_p7, %p1819_p6 }
 0x31d   : > { %p1695_p0 = por %p1694_p13, %p1693_p12 }
 0x31e   : > { %p1691_p11 = pneg %p1690_p10 }
 0x31f   : > { %p1697_p2 = por %p1696_p1, %p1695_p0 }
 0x321   : > { %p1698_p3 = pnand %p1697_p2, %p1691_p11 }
 0x323   : > { %1701 = shalt.err (!%p1698_p3)
}
 0x324   : > { %1491 = dma.vmem_to_hbm [thread:$0]  (%p1819_p6), %s2442_s17, 256, %s2448_s25, %s2450_s30, %s1746_s22, %s1747_s13, %s1748_s14   ;;  %v1198_v24 = vlaneseq }
 0x325   : > { %s1486_s15 = spop %1485  ;;  %s2537_s10 = sshll.u32 %s2358_s6, 3 }
 0x326   : > { %v1199_v49 = vshrl.u32 %v1198_v24, 7  ;;  %s363_s7 = scalar_lea.vmem %s2532_s5, %s2537_s10  ;;  %s1488_s12 = spop %1487  ;;  %v1201_v41 = vstv %s1486_s15 }
 0x327   : > { %v1202_v42 = vstv %s1488_s12 }
 0x328   : > { %vm1200_vm0 = vcmp.lt.s32.totalorder %v1199_v49, 4 }
 0x329   : > { %v1203_v44 = vsel %vm1200_vm0, %v1201_v41, %v1202_v42 }
 0x32a   : > { %1204 = vst [vmem:[%s363_s7] sm:$0xff] %v1203_v44 }
 0x32b PF: > { %s1292_s28 = sand.u32 1, %s1728_s18   ;;  %p1496_p6 = pnand %p1449_p9, %p1825_p8 }
 0x32c   : > { %s1293_s17 = scalar_lea.sflag [#allocation4], %s1292_s28 }
 0x32d   : > { %1719 = dma.done.wait (!%p1496_p6), %s1293_s17, 128  }
 0x32e   : > { %1721 = vsyncadd (!%p1496_p6), %s1293_s17, 4294967168  ;;  %s2538_s6 = sadd.s32 4294967294, %s1740_s21  }
 0x32f   : > { %s1301_s25 = sand.u32 1, %s2538_s6  }
 0x330   : > { %s1302_s30 = scalar_lea.sflag [#allocation6], %s1301_s25 }
 0x331   : > { %1723 = dma.done.wait (!%p1496_p6), %s1302_s30, 512  }
 0x332   : > { %1725 = vsyncadd (!%p1496_p6), %s1302_s30, 4294966784  ;;  %p19_p4 = scmp.ge.s32.totalorder %s1805_s24, 4   ;;  %s2539_s18 = smov %s1732_s19 }
 0x333   : > { %s2540_s19 = smov %s1736_s20  ;;  %s2541_s20 = smov %s1817_s27 }
 0x334   : > { %s2542_s21 = smov %s1805_s24  ;;  %21 = sbr.rel (!%p19_p4) target bundleno = 5 (0x5), region = 165 }
 0x33b   :  { %1323 = vsyncpa [#allocation4], 1 }
 0x33c   :  { %1325 = vsyncpa [#allocation4 + $0x1], 1 }
 0x33d   :  { %1326 = vsyncpa [#allocation6], 1 }
 0x33e   :  { %1328 = vsyncpa [#allocation6 + $0x1], 1 }

</bundles_post_ra>
